<compile_context>
chip_gen: v5e
topology: v5e:2x2
jax: 0.10.0
libtpu: 0.0.40
codegen_flags: <defaults>
</compile_context>

<pallas_src>
import functools
import math

import jax
import jax.numpy as jnp
from jax.experimental import pallas as pl
from jax.experimental.pallas import tpu as pltpu


def mlp_kernel(x_ref, w1_ref, b1_ref, w2_ref, b2_ref, w3_ref, b3_ref, o_ref):
    x = x_ref[...]                                   # (bt, feed) bf16

    # fc1 + ReLU  (bf16 MXU matmul, f32 accumulate / elementwise)
    h1 = jnp.dot(x, w1_ref[...], preferred_element_type=jnp.float32)
    h1 = jnp.maximum(h1 + b1_ref[...], 0.0)

    # Dropout(0.2): identity at inference time.
    # TODO(synk): train-mode dropout would use pltpu.prng_seed/prng_random_bits here.

    # fc2 + ReLU  (bf16 MXU matmul, f32 accumulate)
    h2 = jnp.dot(h1.astype(w2_ref.dtype), w2_ref[...],
                 preferred_element_type=jnp.float32)
    h2 = jnp.maximum(h2 + b2_ref[...], 0.0)

    # fcOut + sigmoid. Kept in f32 (K=64 -> essentially free) for close parity
    # with the PyTorch f32 forward; output block is the true out_size wide.
    logits = jnp.dot(h2, w3_ref[...],
                     preferred_element_type=jnp.float32) + b3_ref[...]
    o_ref[...] = jax.nn.sigmoid(logits).astype(o_ref.dtype)


def _round_up(n, m):
    return pl.cdiv(n, m) * m


def _detect_num_cores():
    """TensorCores per chip: 2 on v7x, 1 on v5e/v6e. Best-effort heuristic."""
    try:
        kind = (getattr(jax.devices()[0], "device_kind", "") or "").lower()
        if "v7" in kind:
            return 2
    except Exception:
        pass
    return 1


@functools.partial(jax.jit, static_argnames=("batch_tile", "num_cores"))
def mlp_forward(x, w1, b1, w2, b2, w3, b3, *, batch_tile=1024, num_cores=1):
    """x: (B, feed) f32; w_i: (in_i, out_i) f32; b_i: (1, out_i) f32."""
    B, feed = x.shape
    fc1_units = w1.shape[1]
    fc2_units = w2.shape[1]
    out_size = w3.shape[1]

    # ---- grid shaping ------------------------------------------------------
    # As few grid steps as possible (each step ~0.35 us overhead), but at
    # least `num_cores` balanced "parallel" steps so v7x's two TensorCores
    # both get real rows.  bt is rounded to 8 sublanes; padding is minimal
    # (e.g. B=300 -> 304 rows, not 512).
    n_steps = max(num_cores, pl.cdiv(B, batch_tile))
    n_steps = _round_up(n_steps, num_cores)
    bt = _round_up(pl.cdiv(B, n_steps), 8)
    B_pad = bt * n_steps

    # ---- operand prep (fused under jit) -------------------------------------
    x_bf = x.astype(jnp.bfloat16)                    # halves input DMA bytes
    if B_pad != B:
        x_bf = jnp.pad(x_bf, ((0, B_pad - B), (0, 0)))
    w1_bf = w1.astype(jnp.bfloat16)
    w2_bf = w2.astype(jnp.bfloat16)
    # w3 / biases stay f32.

    # Weights/biases are tiny (<64 KB total) and grid-invariant; with the grid
    # usually collapsed to 1-2 steps the default buffering cost is negligible.
    # Revisit pipeline_mode only if hidden widths grow into the MB range.
    out = pl.pallas_call(
        mlp_kernel,
        out_shape=jax.ShapeDtypeStruct((B_pad, out_size), jnp.float32),
        grid_spec=pltpu.PrefetchScalarGridSpec(
            num_scalar_prefetch=0,
            grid=(n_steps,),
            in_specs=[
                pl.BlockSpec((bt, feed), lambda i: (i, 0)),
                pl.BlockSpec((feed, fc1_units), lambda i: (0, 0)),
                pl.BlockSpec((1, fc1_units), lambda i: (0, 0)),
                pl.BlockSpec((fc1_units, fc2_units), lambda i: (0, 0)),
                pl.BlockSpec((1, fc2_units), lambda i: (0, 0)),
                pl.BlockSpec((fc2_units, out_size), lambda i: (0, 0)),
                pl.BlockSpec((1, out_size), lambda i: (0, 0)),
            ],
            out_specs=pl.BlockSpec((bt, out_size), lambda i: (i, 0)),
        ),
        compiler_params=pltpu.CompilerParams(
            dimension_semantics=("parallel",)
        ),
    )(x_bf, w1_bf, b1, w2_bf, b2, w3, b3)

    # Strip batch padding (fused slice under jit; no extra HBM pass).
    return out[:B] if B_pad != B else out


def xavier_uniform(key, fan_in, fan_out, dtype=jnp.float32):
    # matches torch.nn.init.xavier_uniform_ (gain=1); pre-transposed layout
    bound = math.sqrt(6.0 / (fan_in + fan_out))
    return jax.random.uniform(key, (fan_in, fan_out), dtype, -bound, bound)


def linear_bias_init(key, fan_in, fan_out, dtype=jnp.float32):
    # PyTorch default Linear bias init: U(-1/sqrt(fan_in), 1/sqrt(fan_in))
    bound = 1.0 / math.sqrt(fan_in)
    return jax.random.uniform(key, (1, fan_out), dtype, -bound, bound)


def mlp_reference(x, w1, b1, w2, b2, w3, b3):
    h1 = jnp.maximum(x @ w1 + b1, 0.0)
    h2 = jnp.maximum(h1 @ w2 + b2, 0.0)
    return jax.nn.sigmoid(h2 @ w3 + b3)


if __name__ == "__main__":
    # Small shapes consistent with the module's forward; batch=300 is not a
    # tile multiple so it also exercises the padding/slicing path.
    batch = 300
    feed_size = 32
    fc1_units = 64
    fc2_units = 64
    output_size = 16

    key = jax.random.PRNGKey(0)
    kx, k1w, k1b, k2w, k2b, k3w, k3b = jax.random.split(key, 7)

    x = jax.random.normal(kx, (batch, feed_size), jnp.float32)

    w1 = xavier_uniform(k1w, feed_size, fc1_units)
    b1 = linear_bias_init(k1b, feed_size, fc1_units)
    w2 = xavier_uniform(k2w, fc1_units, fc2_units)
    b2 = linear_bias_init(k2b, fc1_units, fc2_units)
    w3 = xavier_uniform(k3w, fc2_units, output_size)
    b3 = linear_bias_init(k3b, fc2_units, output_size)

    num_cores = _detect_num_cores()   # 2 on v7x -> two balanced tiles; else 1

    prob = mlp_forward(x, w1, b1, w2, b2, w3, b3, num_cores=num_cores)
    jax.block_until_ready(prob)

    assert prob.shape == (batch, output_size)
    assert bool(jnp.all((prob >= 0.0) & (prob <= 1.0)))

    # correctness vs. pure-JAX f32 reference (loose tol for bf16 fc1/fc2 matmuls)
    ref = mlp_reference(x, w1, b1, w2, b2, w3, b3)
    max_err = float(jnp.max(jnp.abs(prob - ref)))
    assert max_err < 5e-2, f"max abs error {max_err}"

    print("KERNEL_OK")
</pallas_src>

<mosaic_0001>
module attributes {stable_mosaic.version = 11 : i64} {
  func.func @mlp_kernel(%arg0: i32, %arg1: memref<304x32xbf16, #tpu.memory_space<vmem>>, %arg2: memref<32x64xbf16, #tpu.memory_space<vmem>>, %arg3: memref<1x64xf32, #tpu.memory_space<vmem>>, %arg4: memref<64x64xbf16, #tpu.memory_space<vmem>>, %arg5: memref<1x64xf32, #tpu.memory_space<vmem>>, %arg6: memref<64x16xf32, #tpu.memory_space<vmem>>, %arg7: memref<1x16xf32, #tpu.memory_space<vmem>>, %arg8: memref<304x16xf32, #tpu.memory_space<vmem>>) attributes {dimension_semantics = [#tpu.dimension_semantics<parallel>], iteration_bounds = array<i64: 1>, scalar_prefetch = 0 : i64, scratch_operands = 0 : i64, tpu.core_type = #tpu.core_type<tc>, window_params = [{transform_indices = @transform_0, window_bounds = array<i64: 304, 32>}, {pipeline_mode = #tpu.pipeline_mode<synchronous>, transform_indices = @transform_1, window_bounds = array<i64: 32, 64>}, {pipeline_mode = #tpu.pipeline_mode<synchronous>, transform_indices = @transform_2, window_bounds = array<i64: 1, 64>}, {pipeline_mode = #tpu.pipeline_mode<synchronous>, transform_indices = @transform_3, window_bounds = array<i64: 64, 64>}, {pipeline_mode = #tpu.pipeline_mode<synchronous>, transform_indices = @transform_4, window_bounds = array<i64: 1, 64>}, {pipeline_mode = #tpu.pipeline_mode<synchronous>, transform_indices = @transform_5, window_bounds = array<i64: 64, 16>}, {pipeline_mode = #tpu.pipeline_mode<synchronous>, transform_indices = @transform_6, window_bounds = array<i64: 1, 16>}, {transform_indices = @transform_7, window_bounds = array<i64: 304, 16>}]} {
    %c0 = arith.constant 0 : index
    %c0_0 = arith.constant 0 : index
    %0 = vector.load %arg1[%c0, %c0_0] : memref<304x32xbf16, #tpu.memory_space<vmem>>, vector<304x32xbf16>
    %c0_1 = arith.constant 0 : index
    %c0_2 = arith.constant 0 : index
    %1 = vector.load %arg2[%c0_1, %c0_2] : memref<32x64xbf16, #tpu.memory_space<vmem>>, vector<32x64xbf16>
    %cst = arith.constant dense<0.000000e+00> : vector<304x64xf32>
    %2 = tpu.matmul %0, %1, %cst {dimension_numbers = #tpu.dot_dimension_numbers<[1], [0], [0], [1], [0, 0, 1, 1], [], []>} : vector<304x32xbf16>, vector<32x64xbf16>, vector<304x64xf32> -> vector<304x64xf32>
    %c0_3 = arith.constant 0 : index
    %c0_4 = arith.constant 0 : index
    %3 = vector.load %arg3[%c0_3, %c0_4] : memref<1x64xf32, #tpu.memory_space<vmem>>, vector<1x64xf32>
    %4 = vector.broadcast %3 : vector<1x64xf32> to vector<304x64xf32>
    %5 = arith.addf %2, %4 : vector<304x64xf32>
    %cst_5 = arith.constant 0.000000e+00 : f32
    %6 = vector.broadcast %cst_5 : f32 to vector<304x64xf32>
    %7 = arith.maximumf %5, %6 : vector<304x64xf32>
    %8 = arith.truncf %7 : vector<304x64xf32> to vector<304x64xbf16>
    %c0_6 = arith.constant 0 : index
    %c0_7 = arith.constant 0 : index
    %9 = vector.load %arg4[%c0_6, %c0_7] : memref<64x64xbf16, #tpu.memory_space<vmem>>, vector<64x64xbf16>
    %cst_8 = arith.constant dense<0.000000e+00> : vector<304x64xf32>
    %10 = tpu.matmul %8, %9, %cst_8 {dimension_numbers = #tpu.dot_dimension_numbers<[1], [0], [0], [1], [0, 0, 1, 1], [], []>} : vector<304x64xbf16>, vector<64x64xbf16>, vector<304x64xf32> -> vector<304x64xf32>
    %c0_9 = arith.constant 0 : index
    %c0_10 = arith.constant 0 : index
    %11 = vector.load %arg5[%c0_9, %c0_10] : memref<1x64xf32, #tpu.memory_space<vmem>>, vector<1x64xf32>
    %12 = vector.broadcast %11 : vector<1x64xf32> to vector<304x64xf32>
    %13 = arith.addf %10, %12 : vector<304x64xf32>
    %cst_11 = arith.constant 0.000000e+00 : f32
    %14 = vector.broadcast %cst_11 : f32 to vector<304x64xf32>
    %15 = arith.maximumf %13, %14 : vector<304x64xf32>
    %c0_12 = arith.constant 0 : index
    %c0_13 = arith.constant 0 : index
    %16 = vector.load %arg6[%c0_12, %c0_13] : memref<64x16xf32, #tpu.memory_space<vmem>>, vector<64x16xf32>
    %cst_14 = arith.constant dense<0.000000e+00> : vector<304x16xf32>
    %17 = tpu.matmul %15, %16, %cst_14 {dimension_numbers = #tpu.dot_dimension_numbers<[1], [0], [0], [1], [0, 0, 1, 1], [], []>} : vector<304x64xf32>, vector<64x16xf32>, vector<304x16xf32> -> vector<304x16xf32>
    %c0_15 = arith.constant 0 : index
    %c0_16 = arith.constant 0 : index
    %18 = vector.load %arg7[%c0_15, %c0_16] : memref<1x16xf32, #tpu.memory_space<vmem>>, vector<1x16xf32>
    %19 = vector.broadcast %18 : vector<1x16xf32> to vector<304x16xf32>
    %20 = arith.addf %17, %19 : vector<304x16xf32>
    %21 = arith.negf %20 : vector<304x16xf32>
    %22 = math.exp %21 : vector<304x16xf32>
    %cst_17 = arith.constant 1.000000e+00 : f32
    %23 = vector.broadcast %cst_17 : f32 to vector<304x16xf32>
    %24 = arith.addf %23, %22 : vector<304x16xf32>
    %25 = arith.divf %23, %24 : vector<304x16xf32>
    %c0_18 = arith.constant 0 : index
    %c0_19 = arith.constant 0 : index
    %26 = vector.load %arg8[%c0_18, %c0_19] : memref<304x16xf32, #tpu.memory_space<vmem>>, vector<304x16xf32>
    tpu.vector_store %arg8[%c0_18, %c0_19], %25 {strides = array<i32>} : memref<304x16xf32, #tpu.memory_space<vmem>>, vector<304x16xf32>,
    return
  }
  func.func @transform_0(%arg0: i32) -> (i32, i32) {
    %c0_i32 = arith.constant 0 : i32
    %c0_i32_0 = arith.constant 0 : i32
    return %arg0, %c0_i32 : i32, i32
  }
  func.func @transform_1(%arg0: i32) -> (i32, i32) {
    %c0_i32 = arith.constant 0 : i32
    %c0_i32_0 = arith.constant 0 : i32
    %c0_i32_1 = arith.constant 0 : i32
    return %c0_i32, %c0_i32_0 : i32, i32
  }
  func.func @transform_2(%arg0: i32) -> (i32, i32) {
    %c0_i32 = arith.constant 0 : i32
    %c0_i32_0 = arith.constant 0 : i32
    %c0_i32_1 = arith.constant 0 : i32
    return %c0_i32, %c0_i32_0 : i32, i32
  }
  func.func @transform_3(%arg0: i32) -> (i32, i32) {
    %c0_i32 = arith.constant 0 : i32
    %c0_i32_0 = arith.constant 0 : i32
    %c0_i32_1 = arith.constant 0 : i32
    return %c0_i32, %c0_i32_0 : i32, i32
  }
  func.func @transform_4(%arg0: i32) -> (i32, i32) {
    %c0_i32 = arith.constant 0 : i32
    %c0_i32_0 = arith.constant 0 : i32
    %c0_i32_1 = arith.constant 0 : i32
    return %c0_i32, %c0_i32_0 : i32, i32
  }
  func.func @transform_5(%arg0: i32) -> (i32, i32) {
    %c0_i32 = arith.constant 0 : i32
    %c0_i32_0 = arith.constant 0 : i32
    %c0_i32_1 = arith.constant 0 : i32
    return %c0_i32, %c0_i32_0 : i32, i32
  }
  func.func @transform_6(%arg0: i32) -> (i32, i32) {
    %c0_i32 = arith.constant 0 : i32
    %c0_i32_0 = arith.constant 0 : i32
    %c0_i32_1 = arith.constant 0 : i32
    return %c0_i32, %c0_i32_0 : i32, i32
  }
  func.func @transform_7(%arg0: i32) -> (i32, i32) {
    %c0_i32 = arith.constant 0 : i32
    %c0_i32_0 = arith.constant 0 : i32
    return %arg0, %c0_i32 : i32, i32
  }
}

</mosaic_0001>

<bundles_post_ra>
// kernel: mlp_forward.1
= control target key start
LH: loop header
LB: loop body
LE: loop exit
PB: predicated region body
PF: predicated region fallthrough
CT: control target
= control target key end

     0   :  { %vm180_vm0 = vcmask 261120   ;;  %vm435_vm1 = vcmask 523264   ;;  %vm1614_vm5 = vcmask 130048   ;;  %s2573_s1 = inlined_call_operand.vmem [shape: bf16[32,64], index: 1, kind: input, shape index: {}]   ;;  %s2574_s2 = inlined_call_operand.vmem [shape: f32[1,64], index: 2, kind: input, shape index: {}]   ;;  %s2575_s0 = inlined_call_operand.vmem [shape: bf16[304,32], index: 0, kind: input, shape index: {}]   ;;  %s2576_s3 = inlined_call_operand.vmem [shape: bf16[64,64], index: 3, kind: input, shape index: {}]   ;;  %s2577_s4 = inlined_call_operand.vmem [shape: f32[1,64], index: 4, kind: input, shape index: {}]   ;;  %s2578_s5 = inlined_call_operand.vmem [shape: f32[64,16], index: 5, kind: input, shape index: {}]   ;;  %s2579_s6 = inlined_call_operand.vmem [shape: f32[1,16], index: 6, kind: input, shape index: {}]   ;;  %s2580_s7 = inlined_call_operand.vmem [shape: f32[304,16], index: 7, kind: output, shape index: {}]  }
   0x1   :  { %v1891_v0 = vld [vmem:[%s2573_s1 + $0x8] sm:$0xff]  ;;  %v1890_v1 = vld [vmem:[%s2573_s1] sm:$0xff]  ;;  %v1873_v4 = vld [vmem:[%s2575_s0 + $0x10] sm:$0xff] }
   0x2   :  { %244 = vmatpush.bf16.msra.mxu0 %v1891_v0  ;;  %1896 = vmatpush.bf16.msra.mxu3 %v1891_v0  ;;  %v1871_v2 = vld [vmem:[%s2575_s0] sm:$0xff]  ;;  %v1872_v3 = vld [vmem:[%s2575_s0 + $0x8] sm:$0xff]  ;;  %v1874_v5 = vld [vmem:[%s2575_s0 + $0x18] sm:$0xff] }
   0x3   :  { %v1875_v6 = vld [vmem:[%s2575_s0 + $0x20] sm:$0xff]  ;;  %v1876_v7 = vld [vmem:[%s2575_s0 + $0x28] sm:$0xff]  ;;  %v1895_v8 = vld [vmem:[%s2576_s3 + $0x18] sm:$0xff] }
   0x4   :  { %v1877_v9 = vld [vmem:[%s2575_s0 + $0x30] sm:$0xff]  ;;  %497 = vmatpush.bf16.msra.mxu1 %v1895_v8  ;;  %v1893_v11 = vld [vmem:[%s2576_s3 + $0x8] sm:$0xff]  ;;  %v1892_v12 = vld [vmem:[%s2576_s3] sm:$0xff] }
   0x5   :  { %v1894_v10 = vld [vmem:[%s2576_s3 + $0x10] sm:$0xff]  ;;  %v1878_v13 = vld [vmem:[%s2575_s0 + $0x38] sm:$0xff]  ;;  %v1879_v14 = vld [vmem:[%s2575_s0 + $0x40] sm:$0xff] }
   0x6   :  { %245 = vmatpush.bf16.msra.mxu0 %v1890_v1  ;;  %1897 = vmatpush.bf16.msra.mxu3 %v1890_v1  ;;  %v2163_v16 = vld [vmem:[%s2574_s2] ss:$0 sm:$0xff]  ;;  %v1880_v23 = vld [vmem:[%s2575_s0 + $0x48] sm:$0xff]  ;;  %v1881_v31 = vld [vmem:[%s2575_s0 + $0x50] sm:$0xff] }
   0x7   :  { %v1882_v39 = vld [vmem:[%s2575_s0 + $0x58] sm:$0xff]  ;;  %v1883_v47 = vld [vmem:[%s2575_s0 + $0x60] sm:$0xff]  ;;  %v1884_v56 = vld [vmem:[%s2575_s0 + $0x68] sm:$0xff] }
   0x8   :  { %498 = vmatpush.bf16.msra.mxu1 %v1894_v10  ;;  %v1886_v49 = vld [vmem:[%s2575_s0 + $0x78] sm:$0xff]  ;;  %v1887_v58 = vld [vmem:[%s2575_s0 + $0x80] sm:$0xff]  ;;  %v1885_v1 = vld [vmem:[%s2575_s0 + $0x70] sm:$0xff] }
   0x9   :  { %1741 = vmatmul.msk.bf16.vlgmr.msra.gmra.mxu0 %vm180_vm0, %v1871_v2  ;;  %1756 = vmatmul.msk.bf16.vlgmr.msra.gmra.mxu3 %vm180_vm0, %v1886_v49 }
   0xa   :  { %1898 = vmatpush.bf16.msrb.mxu3 %v1895_v8  ;;  %v639_v8 = vld [vmem:[%s2578_s5 + $0x20] sm:$0xff] }
   0xc   :  { %499 = vmatpush.bf16.msra.mxu1 %v1893_v11 }
   0xe   :  { %1899 = vmatpush.bf16.msrb.mxu3 %v1894_v10 }
  0x10   :  { %500 = vmatpush.bf16.msra.mxu1 %v1892_v12 }
  0x12   :  { %1900 = vmatpush.bf16.msrb.mxu3 %v1893_v11  ;;  %v638_v11 = vld [vmem:[%s2578_s5 + $0x18] sm:$0xff] }
  0x16   :  { %1901 = vmatpush.bf16.msrb.mxu3 %v1892_v12 }
  0x19   :  { %1742 = vmatmul.msk.bf16.gmra.mxu0 %vm180_vm0, %v1872_v3  ;;  %1757 = vmatmul.msk.bf16.gmra.mxu3 %vm180_vm0, %v1887_v58  ;;  %v642_v3 = vld [vmem:[%s2578_s5 + $0x38] sm:$0xff] }
  0x1a   :  { %769 = vmatpush.msra.mxu2 %v642_v3  ;;  %1902 = vmatpush.msra.mxu3 %v642_v3 }
  0x29   :  { %1743 = vmatmul.msk.bf16.gmra.mxu0 %vm180_vm0, %v1873_v4  ;;  %v641_v4 = vld [vmem:[%s2578_s5 + $0x30] sm:$0xff] }
  0x2a   :  { %770 = vmatpush.msra.mxu2 %v641_v4  ;;  %1903 = vmatpush.msra.mxu3 %v641_v4 }
  0x39   :  { %1744 = vmatmul.msk.bf16.gmra.mxu0 %vm180_vm0, %v1874_v5  ;;  %v1888_v5 = vld [vmem:[%s2575_s0 + $0x88] sm:$0xff] }
  0x3a   :  { %1758 = vmatmul.msk.bf16.gmra.mxu3 %vm180_vm0, %v1888_v5 }
  0x49   :  { %1745 = vmatmul.msk.bf16.gmra.mxu0 %vm180_vm0, %v1875_v6  ;;  %v640_v6 = vld [vmem:[%s2578_s5 + $0x28] sm:$0xff] }
  0x4a   :  { %771 = vmatpush.msra.mxu2 %v640_v6  ;;  %1904 = vmatpush.msra.mxu3 %v640_v6 }
  0x4c   :  { %772 = vmatpush.msra.mxu2 %v639_v8  ;;  %1905 = vmatpush.msra.mxu3 %v639_v8 }
  0x4e   :  { %773 = vmatpush.msra.mxu2 %v638_v11  ;;  %1906 = vmatpush.msra.mxu3 %v638_v11 }
  0x59   :  { %1746 = vmatmul.msk.bf16.gmra.mxu0 %vm180_vm0, %v1876_v7 }
  0x69   :  { %1747 = vmatmul.msk.bf16.gmra.mxu0 %vm180_vm0, %v1877_v9 }
  0x79   :  { %1748 = vmatmul.msk.bf16.gmra.mxu0 %vm180_vm0, %v1878_v13 }
  0x86   :  { %v247_v15 = vpop.f32.mrf.mxu0 }
  0x87   :  { %v248_v17 = vadd.f32 %v2163_v16, %v247_v15 }
  0x89   :  { %1749 = vmatmul.msk.bf16.gmra.mxu0 %vm180_vm0, %v1879_v14  ;;  %v342_v20 = vmax.f32 %v248_v17, 0.0  ;;  %v637_v14 = vld [vmem:[%s2578_s5 + $0x10] sm:$0xff]  ;;  %v636_v17 = vld [vmem:[%s2578_s5 + $0x8] sm:$0xff] }
  0x8a   :  { %774 = vmatpush.msra.mxu2 %v637_v14  ;;  %1907 = vmatpush.msra.mxu3 %v637_v14 }
  0x8c   :  { %775 = vmatpush.msra.mxu2 %v636_v17  ;;  %1908 = vmatpush.msra.mxu3 %v636_v17 }
  0x8e   :  { %v249_v18 = vpop.f32.mrf.mxu0 }
  0x8f   :  { %v250_v19 = vadd.f32 %v2163_v16, %v249_v18  ;;  %v635_v18 = vld [vmem:[%s2578_s5] sm:$0xff] }
  0x90   :  { %776 = vmatpush.msra.mxu2 %v635_v18  ;;  %1909 = vmatpush.msra.mxu3 %v635_v18 }
  0x91   :  { %v343_v21 = vmax.f32 %v250_v19, 0.0 }
  0x93   :  { %v380_v22 = vpack.c.bf16 %v343_v21, %v342_v20  ;;  %v1889_v20 = vld [vmem:[%s2575_s0 + $0x90] sm:$0xff] }
  0x94   :  { %1759 = vmatmul.msk.bf16.gmra.mxu3 %vm180_vm0, %v1889_v20 }
  0x95   :  { %1776 = vmatmul.msk.bf16.vlgmr.msra.gmra.mxu1 %vm435_vm1, %v380_v22 }
  0x96   :  { %v252_v24 = vpop.f32.mrf.mxu0 }
  0x97   :  { %v253_v25 = vadd.f32 %v2163_v16, %v252_v24 }
  0x99   :  { %1750 = vmatmul.msk.bf16.gmra.mxu0 %vm180_vm0, %v1880_v23  ;;  %v344_v28 = vmax.f32 %v253_v25, 0.0 }
  0x9e   :  { %v254_v26 = vpop.f32.mrf.mxu0 }
  0x9f   :  { %v255_v27 = vadd.f32 %v2163_v16, %v254_v26 }
  0xa1   :  { %v345_v29 = vmax.f32 %v255_v27, 0.0 }
  0xa3   :  { %v381_v30 = vpack.c.bf16 %v345_v29, %v344_v28 }
  0xa5   :  { %1777 = vmatmul.msk.bf16.gmra.mxu1 %vm435_vm1, %v381_v30 }
  0xa6   :  { %v257_v32 = vpop.f32.mrf.mxu0 }
  0xa7   :  { %v258_v33 = vadd.f32 %v2163_v16, %v257_v32 }
  0xa9   :  { %1751 = vmatmul.msk.bf16.gmra.mxu0 %vm180_vm0, %v1881_v31  ;;  %v346_v36 = vmax.f32 %v258_v33, 0.0  ;;  %v2259_v31 = vld [vmem:[%s2577_s4] ss:$0 sm:$0xff] }
  0xae   :  { %v259_v34 = vpop.f32.mrf.mxu0 }
  0xaf   :  { %v260_v35 = vadd.f32 %v2163_v16, %v259_v34 }
  0xb1   :  { %v347_v37 = vmax.f32 %v260_v35, 0.0 }
  0xb3   :  { %v382_v38 = vpack.c.bf16 %v347_v37, %v346_v36 }
  0xb5   :  { %1778 = vmatmul.msk.bf16.gmra.mxu1 %vm435_vm1, %v382_v38 }
  0xb6   :  { %v262_v40 = vpop.f32.mrf.mxu0 }
  0xb7   :  { %v263_v41 = vadd.f32 %v2163_v16, %v262_v40 }
  0xb9   :  { %1752 = vmatmul.msk.bf16.gmra.mxu0 %vm180_vm0, %v1882_v39  ;;  %v348_v44 = vmax.f32 %v263_v41, 0.0 }
  0xbe   :  { %v264_v42 = vpop.f32.mrf.mxu0 }
  0xbf   :  { %v265_v43 = vadd.f32 %v2163_v16, %v264_v42 }
  0xc1   :  { %v349_v45 = vmax.f32 %v265_v43, 0.0 }
  0xc3   :  { %v383_v46 = vpack.c.bf16 %v349_v45, %v348_v44 }
  0xc5   :  { %1779 = vmatmul.msk.bf16.gmra.mxu1 %vm435_vm1, %v383_v46 }
  0xc6   :  { %v267_v48 = vpop.f32.mrf.mxu0 }
  0xc7   :  { %v268_v50 = vadd.f32 %v2163_v16, %v267_v48 }
  0xc9   :  { %1753 = vmatmul.msk.bf16.gmra.mxu0 %vm180_vm0, %v1883_v47  ;;  %v350_v53 = vmax.f32 %v268_v50, 0.0 }
  0xce   :  { %v269_v51 = vpop.f32.mrf.mxu0 }
  0xcf   :  { %v270_v52 = vadd.f32 %v2163_v16, %v269_v51 }
  0xd1   :  { %v351_v54 = vmax.f32 %v270_v52, 0.0 }
  0xd3   :  { %v384_v55 = vpack.c.bf16 %v351_v54, %v350_v53 }
  0xd5   :  { %1780 = vmatmul.msk.bf16.gmra.mxu1 %vm435_vm1, %v384_v55 }
  0xd6   :  { %v272_v57 = vpop.f32.mrf.mxu0 }
  0xd7   :  { %v273_v59 = vadd.f32 %v2163_v16, %v272_v57 }
  0xd9   :  { %1754 = vmatmul.msk.bf16.gmra.mxu0 %vm180_vm0, %v1884_v56  ;;  %v352_v62 = vmax.f32 %v273_v59, 0.0 }
  0xde   :  { %v274_v60 = vpop.f32.mrf.mxu0 }
  0xdf   :  { %v275_v61 = vadd.f32 %v2163_v16, %v274_v60 }
  0xe1   :  { %v353_v63 = vmax.f32 %v275_v61, 0.0 }
  0xe3   :  { %v385_v0 = vpack.c.bf16 %v353_v63, %v352_v62 }
  0xe5   :  { %1781 = vmatmul.msk.bf16.gmra.mxu1 %vm435_vm1, %v385_v0 }
  0xe6   :  { %v277_v2 = vpop.f32.mrf.mxu0 }
  0xe7   :  { %v278_v7 = vadd.f32 %v2163_v16, %v277_v2 }
  0xe9   :  { %1755 = vmatmul.msk.bf16.gmra.mxu0 %vm180_vm0, %v1885_v1  ;;  %v354_v12 = vmax.f32 %v278_v7, 0.0 }
  0xee   :  { %v279_v9 = vpop.f32.mrf.mxu0 }
  0xef   :  { %v280_v10 = vadd.f32 %v2163_v16, %v279_v9 }
  0xf1   :  { %v355_v13 = vmax.f32 %v280_v10, 0.0 }
  0xf3   :  { %v386_v15 = vpack.c.bf16 %v355_v13, %v354_v12 }
  0xf5   :  { %1782 = vmatmul.msk.bf16.gmra.mxu1 %vm435_vm1, %v386_v15 }
  0xf6   :  { %v282_v19 = vpop.f32.mrf.mxu0 }
  0xf7   :  { %v283_v21 = vadd.f32 %v2163_v16, %v282_v19 }
  0xf9   :  { %v356_v24 = vmax.f32 %v283_v21, 0.0 }
  0xfe   :  { %v284_v22 = vpop.f32.mrf.mxu0 }
  0xff   :  { %v285_v23 = vadd.f32 %v2163_v16, %v284_v22 }
 0x101   :  { %v357_v25 = vmax.f32 %v285_v23, 0.0 }
 0x103   :  { %v387_v26 = vpack.c.bf16 %v357_v25, %v356_v24 }
 0x105   :  { %1783 = vmatmul.msk.bf16.gmra.mxu1 %vm435_vm1, %v387_v26 }
 0x106   :  { %v287_v27 = vpop.f32.mrf.mxu0 }
 0x107   :  { %v288_v28 = vadd.f32 %v2163_v16, %v287_v27 }
 0x109   :  { %v358_v32 = vmax.f32 %v288_v28, 0.0 }
 0x10e   :  { %v289_v29 = vpop.f32.mrf.mxu0 }
 0x10f   :  { %v290_v30 = vadd.f32 %v2163_v16, %v289_v29 }
 0x111   :  { %v359_v33 = vmax.f32 %v290_v30, 0.0 }
 0x112   :  { %v502_v34 = vpop.f32.mrf.mxu1 }
 0x113   :  { %v388_v35 = vpack.c.bf16 %v359_v33, %v358_v32  ;;  %v503_v36 = vadd.f32 %v2259_v31, %v502_v34 }
 0x115   :  { %v597_v37 = vmax.f32 %v503_v36, 0.0  ;;  %1784 = vmatmul.msk.bf16.gmra.mxu1 %vm435_vm1, %v388_v35 }
 0x116   :  { %v292_v38 = vpop.f32.mrf.mxu0 }
 0x117   :  { %1795 = vmatmul.msk.f32.vlgmr.msra.gmra.mxu2 %vm435_vm1, %v597_v37  ;;  %v293_v41 = vadd.f32 %v2163_v16, %v292_v38  ;;  %v322_v37 = vpop.f32.mrf.mxu3 }
 0x119   :  { %v360_v45 = vmax.f32 %v293_v41, 0.0 }
 0x11a   :  { %v504_v39 = vpop.f32.mrf.mxu1 }
 0x11b   :  { %v505_v40 = vadd.f32 %v2259_v31, %v504_v39 }
 0x11d   :  { %v598_v42 = vmax.f32 %v505_v40, 0.0 }
 0x11e   :  { %v294_v43 = vpop.f32.mrf.mxu0 }
 0x11f   :  { %v295_v44 = vadd.f32 %v2163_v16, %v294_v43  ;;  %1796 = vmatmul.msk.f32.gmra.mxu2 %vm435_vm1, %v598_v42 }
 0x121   :  { %v361_v46 = vmax.f32 %v295_v44, 0.0 }
 0x122   :  { %v507_v47 = vpop.f32.mrf.mxu1 }
 0x123   :  { %v389_v48 = vpack.c.bf16 %v361_v46, %v360_v45  ;;  %v508_v49 = vadd.f32 %v2259_v31, %v507_v47  ;;  %v324_v45 = vpop.f32.mrf.mxu3 }
 0x125   :  { %v599_v50 = vmax.f32 %v508_v49, 0.0  ;;  %1785 = vmatmul.msk.bf16.gmra.mxu1 %vm435_vm1, %v389_v48 }
 0x126   :  { %v297_v51 = vpop.f32.mrf.mxu0 }
 0x127   :  { %1797 = vmatmul.msk.f32.gmra.mxu2 %vm435_vm1, %v599_v50  ;;  %v298_v54 = vadd.f32 %v2163_v16, %v297_v51 }
 0x129   :  { %v362_v58 = vmax.f32 %v298_v54, 0.0 }
 0x12a   :  { %v509_v52 = vpop.f32.mrf.mxu1 }
 0x12b   :  { %v510_v53 = vadd.f32 %v2259_v31, %v509_v52 }
 0x12d   :  { %v600_v55 = vmax.f32 %v510_v53, 0.0 }
 0x12e   :  { %v299_v56 = vpop.f32.mrf.mxu0 }
 0x12f   :  { %v300_v57 = vadd.f32 %v2163_v16, %v299_v56  ;;  %1798 = vmatmul.msk.f32.gmra.mxu2 %vm435_vm1, %v600_v55  ;;  %v327_v56 = vpop.f32.mrf.mxu3 }
 0x131   :  { %v363_v59 = vmax.f32 %v300_v57, 0.0 }
 0x132   :  { %v512_v60 = vpop.f32.mrf.mxu1 }
 0x133   :  { %v390_v61 = vpack.c.bf16 %v363_v59, %v362_v58  ;;  %v513_v62 = vadd.f32 %v2259_v31, %v512_v60  ;;  %v323_v58 = vadd.f32 %v2163_v16, %v322_v37  ;;  %v325_v59 = vadd.f32 %v2163_v16, %v324_v45 }
 0x135   :  { %v601_v63 = vmax.f32 %v513_v62, 0.0  ;;  %1786 = vmatmul.msk.bf16.gmra.mxu1 %vm435_vm1, %v390_v61  ;;  %v372_v62 = vmax.f32 %v323_v58, 0.0 }
 0x136   :  { %v302_v0 = vpop.f32.mrf.mxu0 }
 0x137   :  { %1799 = vmatmul.msk.f32.gmra.mxu2 %vm435_vm1, %v601_v63  ;;  %v303_v3 = vadd.f32 %v2163_v16, %v302_v0  ;;  %v373_v63 = vmax.f32 %v325_v59, 0.0  ;;  %v329_v0 = vpop.f32.mrf.mxu3 }
 0x139   :  { %v364_v7 = vmax.f32 %v303_v3, 0.0  ;;  %v395_v3 = vpack.c.bf16 %v373_v63, %v372_v62 }
 0x13a   :  { %v514_v1 = vpop.f32.mrf.mxu1 }
 0x13b   :  { %v515_v2 = vadd.f32 %v2259_v31, %v514_v1 }
 0x13d   :  { %v602_v4 = vmax.f32 %v515_v2, 0.0 }
 0x13e   :  { %v304_v5 = vpop.f32.mrf.mxu0 }
 0x13f   :  { %v305_v6 = vadd.f32 %v2163_v16, %v304_v5  ;;  %1800 = vmatmul.msk.f32.gmra.mxu2 %vm435_vm1, %v602_v4  ;;  %v332_v5 = vpop.f32.mrf.mxu3 }
 0x141   :  { %v365_v8 = vmax.f32 %v305_v6, 0.0 }
 0x142   :  { %v517_v9 = vpop.f32.mrf.mxu1 }
 0x143   :  { %v391_v10 = vpack.c.bf16 %v365_v8, %v364_v7  ;;  %v518_v11 = vadd.f32 %v2259_v31, %v517_v9  ;;  %v328_v7 = vadd.f32 %v2163_v16, %v327_v56  ;;  %v330_v8 = vadd.f32 %v2163_v16, %v329_v0 }
 0x145   :  { %v603_v12 = vmax.f32 %v518_v11, 0.0  ;;  %1787 = vmatmul.msk.bf16.gmra.mxu1 %vm435_vm1, %v391_v10  ;;  %v374_v11 = vmax.f32 %v328_v7, 0.0 }
 0x146   :  { %v307_v13 = vpop.f32.mrf.mxu0 }
 0x147   :  { %1801 = vmatmul.msk.f32.gmra.mxu2 %vm435_vm1, %v603_v12  ;;  %v308_v17 = vadd.f32 %v2163_v16, %v307_v13  ;;  %v375_v12 = vmax.f32 %v330_v8, 0.0 }
 0x149   :  { %v366_v21 = vmax.f32 %v308_v17, 0.0  ;;  %v334_v17 = vpop.f32.mrf.mxu3 }
 0x14a   :  { %v519_v14 = vpop.f32.mrf.mxu1 }
 0x14b   :  { %v520_v15 = vadd.f32 %v2259_v31, %v519_v14  ;;  %v396_v14 = vpack.c.bf16 %v375_v12, %v374_v11 }
 0x14d   :  { %v604_v18 = vmax.f32 %v520_v15, 0.0 }
 0x14e   :  { %v309_v19 = vpop.f32.mrf.mxu0 }
 0x14f   :  { %v310_v20 = vadd.f32 %v2163_v16, %v309_v19  ;;  %1802 = vmatmul.msk.f32.gmra.mxu2 %vm435_vm1, %v604_v18  ;;  %v2323_v19 = vld [vmem:[%s2579_s6] ss:$0 sm:$0xff] }
 0x151   :  { %v367_v22 = vmax.f32 %v310_v20, 0.0 }
 0x152   :  { %v522_v23 = vpop.f32.mrf.mxu1 }
 0x153   :  { %v392_v24 = vpack.c.bf16 %v367_v22, %v366_v21  ;;  %v523_v25 = vadd.f32 %v2259_v31, %v522_v23  ;;  %v333_v22 = vadd.f32 %v2163_v16, %v332_v5  ;;  %v335_v23 = vadd.f32 %v2163_v16, %v334_v17 }
 0x155   :  { %v605_v26 = vmax.f32 %v523_v25, 0.0  ;;  %1788 = vmatmul.msk.bf16.gmra.mxu1 %vm435_vm1, %v392_v24 }
 0x156   :  { %v312_v27 = vpop.f32.mrf.mxu0 }
 0x157   :  { %1803 = vmatmul.msk.f32.gmra.mxu2 %vm435_vm1, %v605_v26  ;;  %v313_v30 = vadd.f32 %v2163_v16, %v312_v27 }
 0x159   :  { %v368_v35 = vmax.f32 %v313_v30, 0.0  ;;  %v377_v30 = vmax.f32 %v335_v23, 0.0 }
 0x15a   :  { %v524_v28 = vpop.f32.mrf.mxu1 }
 0x15b   :  { %v525_v29 = vadd.f32 %v2259_v31, %v524_v28  ;;  %v337_v28 = vpop.f32.mrf.mxu3 }
 0x15d   :  { %v606_v32 = vmax.f32 %v525_v29, 0.0  ;;  %v376_v29 = vmax.f32 %v333_v22, 0.0 }
 0x15e   :  { %v314_v33 = vpop.f32.mrf.mxu0 }
 0x15f   :  { %v315_v34 = vadd.f32 %v2163_v16, %v314_v33  ;;  %1804 = vmatmul.msk.f32.gmra.mxu2 %vm435_vm1, %v606_v32 }
 0x161   :  { %v369_v36 = vmax.f32 %v315_v34, 0.0  ;;  %v397_v34 = vpack.c.bf16 %v377_v30, %v376_v29 }
 0x162   :  { %v527_v38 = vpop.f32.mrf.mxu1 }
 0x163   :  { %v393_v39 = vpack.c.bf16 %v369_v36, %v368_v35  ;;  %v528_v40 = vadd.f32 %v2259_v31, %v527_v38 }
 0x165   :  { %v607_v41 = vmax.f32 %v528_v40, 0.0  ;;  %1789 = vmatmul.msk.bf16.gmra.mxu1 %vm435_vm1, %v393_v39 }
 0x166   :  { %v317_v42 = vpop.f32.mrf.mxu0 }
 0x167   :  { %1805 = vmatmul.msk.f32.gmra.mxu2 %vm435_vm1, %v607_v41  ;;  %v318_v46 = vadd.f32 %v2163_v16, %v317_v42  ;;  %v339_v41 = vpop.f32.mrf.mxu3  ;;  %v338_v42 = vadd.f32 %v2163_v16, %v337_v28 }
 0x169   :  { %v370_v50 = vmax.f32 %v318_v46, 0.0 }
 0x16a   :  { %v529_v43 = vpop.f32.mrf.mxu1 }
 0x16b   :  { %v530_v44 = vadd.f32 %v2259_v31, %v529_v43  ;;  %v340_v43 = vadd.f32 %v2163_v16, %v339_v41 }
 0x16d   :  { %v608_v47 = vmax.f32 %v530_v44, 0.0 }
 0x16e   :  { %v319_v48 = vpop.f32.mrf.mxu0 }
 0x16f   :  { %v320_v49 = vadd.f32 %v2163_v16, %v319_v48  ;;  %1806 = vmatmul.msk.f32.gmra.mxu2 %vm435_vm1, %v608_v47 }
 0x171   :  { %v371_v51 = vmax.f32 %v320_v49, 0.0 }
 0x172   :  { %v532_v52 = vpop.f32.mrf.mxu1 }
 0x173   :  { %v394_v53 = vpack.c.bf16 %v371_v51, %v370_v50  ;;  %v533_v54 = vadd.f32 %v2259_v31, %v532_v52  ;;  %v378_v52 = vmax.f32 %v338_v42, 0.0 }
 0x175   :  { %v609_v55 = vmax.f32 %v533_v54, 0.0  ;;  %1790 = vmatmul.msk.bf16.vlgmr.msrb.gmra.mxu3 %vm435_vm1, %v394_v53  ;;  %v379_v54 = vmax.f32 %v340_v43, 0.0 }
 0x177   :  { %1807 = vmatmul.msk.f32.gmra.mxu2 %vm435_vm1, %v609_v55  ;;  %v398_v58 = vpack.c.bf16 %v379_v54, %v378_v52 }
 0x17a   :  { %v534_v57 = vpop.f32.mrf.mxu1 }
 0x17b   :  { %v535_v60 = vadd.f32 %v2259_v31, %v534_v57 }
 0x17d   :  { %v610_v61 = vmax.f32 %v535_v60, 0.0 }
 0x17f   :  { %1808 = vmatmul.msk.f32.gmra.mxu2 %vm435_vm1, %v610_v61 }
 0x182   :  { %v537_v1 = vpop.f32.mrf.mxu1 }
 0x183   :  { %v538_v2 = vadd.f32 %v2259_v31, %v537_v1 }
 0x185   :  { %v611_v4 = vmax.f32 %v538_v2, 0.0  ;;  %1791 = vmatmul.msk.bf16.gmra.mxu3 %vm435_vm1, %v395_v3 }
 0x187   :  { %1809 = vmatmul.msk.f32.gmra.mxu2 %vm435_vm1, %v611_v4 }
 0x18a   :  { %v539_v6 = vpop.f32.mrf.mxu1 }
 0x18b   :  { %v540_v9 = vadd.f32 %v2259_v31, %v539_v6 }
 0x18d   :  { %v612_v10 = vmax.f32 %v540_v9, 0.0 }
 0x18f   :  { %1810 = vmatmul.msk.f32.gmra.mxu2 %vm435_vm1, %v612_v10 }
 0x192   :  { %v542_v13 = vpop.f32.mrf.mxu1 }
 0x193   :  { %v543_v15 = vadd.f32 %v2259_v31, %v542_v13 }
 0x195   :  { %v613_v18 = vmax.f32 %v543_v15, 0.0  ;;  %1792 = vmatmul.msk.bf16.gmra.mxu3 %vm435_vm1, %v396_v14 }
 0x197   :  { %1811 = vmatmul.msk.f32.gmra.mxu2 %vm435_vm1, %v613_v18 }
 0x19a   :  { %v544_v20 = vpop.f32.mrf.mxu1  ;;  %v778_v21 = vpop.f32.mrf.mxu2 }
 0x19b   :  { %v545_v24 = vadd.f32 %v2259_v31, %v544_v20  ;;  %v779_v25 = vadd.f32 %v2323_v19, %v778_v21 }
 0x19d   :  { %v614_v26 = vmax.f32 %v545_v24, 0.0  ;;  %v1833_v27 = vmul.f32 -1.442695, %v779_v25 }
 0x19f   :  { %1913 = vpow2.f32 %v1833_v27  ;;  %1812 = vmatmul.msk.f32.gmra.mxu2 %vm435_vm1, %v614_v26 }
 0x1a2   :  { %v547_v32 = vpop.f32.mrf.mxu1  ;;  %v781_v33 = vpop.f32.mrf.mxu2 }
 0x1a3   :  { %v548_v35 = vadd.f32 %v2259_v31, %v547_v32  ;;  %v782_v36 = vadd.f32 %v2323_v19, %v781_v33 }
 0x1a5   :  { %v1914_v37 = vpop.eup %1913  ;;  %v615_v38 = vmax.f32 %v548_v35, 0.0  ;;  %v1834_v39 = vmul.f32 -1.442695, %v782_v36  ;;  %1793 = vmatmul.msk.bf16.gmra.mxu3 %vm435_vm1, %v397_v34 }
 0x1a6   :  { %v1006_v40 = vadd.f32 1.0, %v1914_v37 }
 0x1a7   :  { %1915 = vpow2.f32 %v1834_v39  ;;  %1813 = vmatmul.msk.f32.gmra.mxu2 %vm435_vm1, %v615_v38 }
 0x1a8   :  { %1917 = vrcp.f32 %v1006_v40  ;;  %v1053_v16 = vand.u32 2147483647, %v1006_v40  ;;  %v1055_v57 = vand.u32 2147483648, %v1006_v40  ;;  %vm1049_vm3 = vweird.f32 %v1006_v40 }
 0x1aa   :  { %v549_v44 = vpop.f32.mrf.mxu1  ;;  %v784_v45 = vpop.f32.mrf.mxu2  ;;  %v1056_v5 = vor.u32 1.1754944e-38, %v1055_v57  ;;  %vm1054_vm6 = vcmp.eq.f32.partialorder %v1053_v16, 8.507059e+37 }
 0x1ab   :  { %v550_v46 = vadd.f32 %v2259_v31, %v549_v44  ;;  %v785_v47 = vadd.f32 %v2323_v19, %v784_v45 }
 0x1ad   :  { %v1916_v48 = vpop.eup %1915  ;;  %v616_v49 = vmax.f32 %v550_v46, 0.0  ;;  %v1835_v50 = vmul.f32 -1.442695, %v785_v47 }
 0x1ae   :  { %v1918_v51 = vpop.eup %1917  ;;  %v1007_v53 = vadd.f32 1.0, %v1916_v48 }
 0x1af   :  { %v1045_v55 = vmul.f32 %v1918_v51, %v1006_v40  ;;  %1919 = vpow2.f32 %v1835_v50  ;;  %1814 = vmatmul.msk.f32.gmra.mxu2 %vm435_vm1, %v616_v49  ;;  %vm1050_vm2 = vweird.f32 %v1918_v51 }
 0x1b0   :  { %1921 = vrcp.f32 %v1007_v53  ;;  %vm1051_vm4 = vmor %vm1049_vm3, %vm1050_vm2  ;;  %v1068_v11 = vand.u32 2147483647, %v1007_v53  ;;  %v1070_v12 = vand.u32 2147483648, %v1007_v53  ;;  %vm1064_vm8 = vweird.f32 %v1007_v53 }
 0x1b1   :  { %v1046_v56 = vsub.f32 1.0, %v1045_v55 }
 0x1b2   :  { %v552_v59 = vpop.f32.mrf.mxu1  ;;  %v787_v60 = vpop.f32.mrf.mxu2  ;;  %v1071_v25 = vor.u32 1.1754944e-38, %v1070_v12  ;;  %vm1069_vm10 = vcmp.eq.f32.partialorder %v1068_v11, 8.507059e+37 }
 0x1b3   :  { %v1047_v61 = vmul.f32 %v1918_v51, %v1046_v56  ;;  %v553_v62 = vadd.f32 %v2259_v31, %v552_v59  ;;  %v788_v63 = vadd.f32 %v2323_v19, %v787_v60 }
 0x1b5   :  { %v1920_v0 = vpop.eup %1919  ;;  %v1048_v1 = vadd.f32 %v1918_v51, %v1047_v61  ;;  %v617_v2 = vmax.f32 %v553_v62, 0.0  ;;  %v1836_v3 = vmul.f32 -1.442695, %v788_v63  ;;  %1794 = vmatmul.msk.bf16.gmra.mxu3 %vm435_vm1, %v398_v58 }
 0x1b6   :  { %v1922_v4 = vpop.eup %1921  ;;  %v1008_v6 = vadd.f32 1.0, %v1920_v0 }
 0x1b7   :  { %v1052_v7 = vsel %vm1051_vm4, %v1918_v51, %v1048_v1  ;;  %v1060_v8 = vmul.f32 %v1922_v4, %v1007_v53  ;;  %1923 = vpow2.f32 %v1836_v3  ;;  %1815 = vmatmul.msk.f32.gmra.mxu2 %vm435_vm1, %v617_v2  ;;  %vm1065_vm7 = vweird.f32 %v1922_v4 }
 0x1b8   :  { %v1057_v9 = vsel %vm1054_vm6, %v1056_v5, %v1052_v7  ;;  %1925 = vrcp.f32 %v1008_v6  ;;  %vm1066_vm9 = vmor %vm1064_vm8, %vm1065_vm7  ;;  %v1083_v32 = vand.u32 2147483647, %v1008_v6  ;;  %v1085_v33 = vand.u32 2147483648, %v1008_v6 }
 0x1b9   :  { %1615 = vst.msk [vmem:[%s2580_s7] sm:$0xff] %vm1614_vm5, %v1057_v9  ;;  %v1061_v10 = vsub.f32 1.0, %v1060_v8  ;;  %vm1079_vm12 = vweird.f32 %v1008_v6 }
 0x1ba   :  { %v554_v13 = vpop.f32.mrf.mxu1  ;;  %v790_v14 = vpop.f32.mrf.mxu2  ;;  %v1086_v44 = vor.u32 1.1754944e-38, %v1085_v33  ;;  %vm1084_vm14 = vcmp.eq.f32.partialorder %v1083_v32, 8.507059e+37 }
 0x1bb   :  { %v1062_v15 = vmul.f32 %v1922_v4, %v1061_v10  ;;  %v555_v17 = vadd.f32 %v2259_v31, %v554_v13  ;;  %v791_v18 = vadd.f32 %v2323_v19, %v790_v14 }
 0x1bd   :  { %v1924_v20 = vpop.eup %1923  ;;  %v1063_v21 = vadd.f32 %v1922_v4, %v1062_v15  ;;  %v618_v22 = vmax.f32 %v555_v17, 0.0  ;;  %v1837_v23 = vmul.f32 -1.442695, %v791_v18 }
 0x1be   :  { %v1926_v24 = vpop.eup %1925  ;;  %v1009_v26 = vadd.f32 1.0, %v1924_v20 }
 0x1bf   :  { %v1067_v27 = vsel %vm1066_vm9, %v1922_v4, %v1063_v21  ;;  %v1075_v28 = vmul.f32 %v1926_v24, %v1008_v6  ;;  %1927 = vpow2.f32 %v1837_v23  ;;  %1816 = vmatmul.msk.f32.gmra.mxu2 %vm435_vm1, %v618_v22  ;;  %vm1080_vm11 = vweird.f32 %v1926_v24 }
 0x1c0   :  { %v1072_v29 = vsel %vm1069_vm10, %v1071_v25, %v1067_v27  ;;  %1929 = vrcp.f32 %v1009_v26  ;;  %vm1081_vm13 = vmor %vm1079_vm12, %vm1080_vm11  ;;  %v1098_v50 = vand.u32 2147483647, %v1009_v26  ;;  %v1100_v51 = vand.u32 2147483648, %v1009_v26 }
 0x1c1   :  { %1616 = vst.msk [vmem:[%s2580_s7 + $0x8] sm:$0xff] %vm1614_vm5, %v1072_v29  ;;  %v1076_v30 = vsub.f32 1.0, %v1075_v28  ;;  %vm1094_vm0 = vweird.f32 %v1009_v26 }
 0x1c2   :  { %v557_v34 = vpop.f32.mrf.mxu1  ;;  %v793_v35 = vpop.f32.mrf.mxu2  ;;  %v1101_v61 = vor.u32 1.1754944e-38, %v1100_v51  ;;  %vm1099_vm3 = vcmp.eq.f32.partialorder %v1098_v50, 8.507059e+37 }
 0x1c3   :  { %v1077_v36 = vmul.f32 %v1926_v24, %v1076_v30  ;;  %v558_v37 = vadd.f32 %v2259_v31, %v557_v34  ;;  %v794_v38 = vadd.f32 %v2323_v19, %v793_v35 }
 0x1c5   :  { %v1928_v39 = vpop.eup %1927  ;;  %v1078_v40 = vadd.f32 %v1926_v24, %v1077_v36  ;;  %v619_v41 = vmax.f32 %v558_v37, 0.0  ;;  %v1838_v42 = vmul.f32 -1.442695, %v794_v38 }
 0x1c6   :  { %v1930_v43 = vpop.eup %1929  ;;  %v1010_v45 = vadd.f32 1.0, %v1928_v39 }
 0x1c7   :  { %v1082_v46 = vsel %vm1081_vm13, %v1926_v24, %v1078_v40  ;;  %v1090_v47 = vmul.f32 %v1930_v43, %v1009_v26  ;;  %1931 = vpow2.f32 %v1838_v42  ;;  %1817 = vmatmul.msk.f32.gmra.mxu2 %vm435_vm1, %v619_v41  ;;  %vm1095_vm15 = vweird.f32 %v1930_v43 }
 0x1c8   :  { %v1087_v48 = vsel %vm1084_vm14, %v1086_v44, %v1082_v46  ;;  %1933 = vrcp.f32 %v1010_v45  ;;  %vm1096_vm2 = vmor %vm1094_vm0, %vm1095_vm15  ;;  %v1113_v3 = vand.u32 2147483647, %v1010_v45  ;;  %v1115_v4 = vand.u32 2147483648, %v1010_v45 }
 0x1c9   :  { %1617 = vst.msk [vmem:[%s2580_s7 + $0x10] sm:$0xff] %vm1614_vm5, %v1087_v48  ;;  %v1091_v49 = vsub.f32 1.0, %v1090_v47  ;;  %vm1109_vm6 = vweird.f32 %v1010_v45 }
 0x1ca   :  { %v559_v52 = vpop.f32.mrf.mxu1  ;;  %v796_v53 = vpop.f32.mrf.mxu2  ;;  %v1116_v15 = vor.u32 1.1754944e-38, %v1115_v4  ;;  %vm1114_vm8 = vcmp.eq.f32.partialorder %v1113_v3, 8.507059e+37 }
 0x1cb   :  { %v1092_v54 = vmul.f32 %v1930_v43, %v1091_v49  ;;  %v560_v55 = vadd.f32 %v2259_v31, %v559_v52  ;;  %v797_v56 = vadd.f32 %v2323_v19, %v796_v53 }
 0x1cd   :  { %v1932_v16 = vpop.eup %1931  ;;  %v1093_v57 = vadd.f32 %v1930_v43, %v1092_v54  ;;  %v620_v58 = vmax.f32 %v560_v55, 0.0  ;;  %v1839_v59 = vmul.f32 -1.442695, %v797_v56 }
 0x1ce   :  { %v1934_v60 = vpop.eup %1933  ;;  %v1011_v62 = vadd.f32 1.0, %v1932_v16 }
 0x1cf   :  { %v1097_v63 = vsel %vm1096_vm2, %v1930_v43, %v1093_v57  ;;  %v1105_v0 = vmul.f32 %v1934_v60, %v1010_v45  ;;  %1935 = vpow2.f32 %v1839_v59  ;;  %1818 = vmatmul.msk.f32.gmra.mxu2 %vm435_vm1, %v620_v58  ;;  %vm1110_vm4 = vweird.f32 %v1934_v60 }
 0x1d0   :  { %v1102_v1 = vsel %vm1099_vm3, %v1101_v61, %v1097_v63  ;;  %1937 = vrcp.f32 %v1011_v62  ;;  %vm1111_vm7 = vmor %vm1109_vm6, %vm1110_vm4  ;;  %v1128_v23 = vand.u32 2147483647, %v1011_v62  ;;  %v1130_v24 = vand.u32 2147483648, %v1011_v62 }
 0x1d1   :  { %1618 = vst.msk [vmem:[%s2580_s7 + $0x18] sm:$0xff] %vm1614_vm5, %v1102_v1  ;;  %v1106_v2 = vsub.f32 1.0, %v1105_v0  ;;  %vm1124_vm10 = vweird.f32 %v1011_v62 }
 0x1d2   :  { %v562_v5 = vpop.f32.mrf.mxu1  ;;  %v799_v6 = vpop.f32.mrf.mxu2  ;;  %v1131_v36 = vor.u32 1.1754944e-38, %v1130_v24  ;;  %vm1129_vm12 = vcmp.eq.f32.partialorder %v1128_v23, 8.507059e+37 }
 0x1d3   :  { %v1107_v7 = vmul.f32 %v1934_v60, %v1106_v2  ;;  %v563_v8 = vadd.f32 %v2259_v31, %v562_v5  ;;  %v800_v9 = vadd.f32 %v2323_v19, %v799_v6 }
 0x1d5   :  { %v1936_v10 = vpop.eup %1935  ;;  %v1108_v11 = vadd.f32 %v1934_v60, %v1107_v7  ;;  %v621_v12 = vmax.f32 %v563_v8, 0.0  ;;  %v1840_v13 = vmul.f32 -1.442695, %v800_v9 }
 0x1d6   :  { %v1938_v14 = vpop.eup %1937  ;;  %v1012_v17 = vadd.f32 1.0, %v1936_v10 }
 0x1d7   :  { %v1112_v18 = vsel %vm1111_vm7, %v1934_v60, %v1108_v11  ;;  %v1120_v20 = vmul.f32 %v1938_v14, %v1011_v62  ;;  %1939 = vpow2.f32 %v1840_v13  ;;  %1819 = vmatmul.msk.f32.gmra.mxu2 %vm435_vm1, %v621_v12  ;;  %vm1125_vm9 = vweird.f32 %v1938_v14 }
 0x1d8   :  { %v1117_v21 = vsel %vm1114_vm8, %v1116_v15, %v1112_v18  ;;  %1941 = vrcp.f32 %v1012_v17  ;;  %vm1126_vm11 = vmor %vm1124_vm10, %vm1125_vm9  ;;  %v1143_v42 = vand.u32 2147483647, %v1012_v17  ;;  %v1145_v43 = vand.u32 2147483648, %v1012_v17 }
 0x1d9   :  { %1619 = vst.msk [vmem:[%s2580_s7 + $0x20] sm:$0xff] %vm1614_vm5, %v1117_v21  ;;  %v1121_v22 = vsub.f32 1.0, %v1120_v20  ;;  %vm1139_vm14 = vweird.f32 %v1012_v17 }
 0x1da   :  { %v564_v25 = vpop.f32.mrf.mxu1  ;;  %v802_v26 = vpop.f32.mrf.mxu2  ;;  %v1146_v54 = vor.u32 1.1754944e-38, %v1145_v43  ;;  %vm1144_vm0 = vcmp.eq.f32.partialorder %v1143_v42, 8.507059e+37 }
 0x1db   :  { %v1122_v27 = vmul.f32 %v1938_v14, %v1121_v22  ;;  %v565_v28 = vadd.f32 %v2259_v31, %v564_v25  ;;  %v803_v29 = vadd.f32 %v2323_v19, %v802_v26 }
 0x1dd   :  { %v1940_v30 = vpop.eup %1939  ;;  %v1123_v32 = vadd.f32 %v1938_v14, %v1122_v27  ;;  %v622_v33 = vmax.f32 %v565_v28, 0.0  ;;  %v1841_v34 = vmul.f32 -1.442695, %v803_v29 }
 0x1de   :  { %v1942_v35 = vpop.eup %1941  ;;  %v1013_v37 = vadd.f32 1.0, %v1940_v30 }
 0x1df   :  { %v1127_v38 = vsel %vm1126_vm11, %v1938_v14, %v1123_v32  ;;  %v1135_v39 = vmul.f32 %v1942_v35, %v1012_v17  ;;  %1943 = vpow2.f32 %v1841_v34  ;;  %1820 = vmatmul.msk.f32.gmra.mxu2 %vm435_vm1, %v622_v33  ;;  %vm1140_vm13 = vweird.f32 %v1942_v35 }
 0x1e0   :  { %v1132_v40 = vsel %vm1129_vm12, %v1131_v36, %v1127_v38  ;;  %1945 = vrcp.f32 %v1013_v37  ;;  %vm1141_vm15 = vmor %vm1139_vm14, %vm1140_vm13  ;;  %v1158_v59 = vand.u32 2147483647, %v1013_v37  ;;  %v1160_v60 = vand.u32 2147483648, %v1013_v37 }
 0x1e1   :  { %1620 = vst.msk [vmem:[%s2580_s7 + $0x28] sm:$0xff] %vm1614_vm5, %v1132_v40  ;;  %v1136_v41 = vsub.f32 1.0, %v1135_v39  ;;  %vm1154_vm3 = vweird.f32 %v1013_v37 }
 0x1e2   :  { %v567_v44 = vpop.f32.mrf.mxu1  ;;  %v805_v45 = vpop.f32.mrf.mxu2  ;;  %v1161_v7 = vor.u32 1.1754944e-38, %v1160_v60  ;;  %vm1159_vm6 = vcmp.eq.f32.partialorder %v1158_v59, 8.507059e+37 }
 0x1e3   :  { %v1137_v46 = vmul.f32 %v1942_v35, %v1136_v41  ;;  %v568_v47 = vadd.f32 %v2259_v31, %v567_v44  ;;  %v806_v48 = vadd.f32 %v2323_v19, %v805_v45 }
 0x1e5   :  { %v1944_v49 = vpop.eup %1943  ;;  %v1138_v50 = vadd.f32 %v1942_v35, %v1137_v46  ;;  %v623_v51 = vmax.f32 %v568_v47, 0.0  ;;  %v1842_v52 = vmul.f32 -1.442695, %v806_v48 }
 0x1e6   :  { %v1946_v53 = vpop.eup %1945  ;;  %v1014_v55 = vadd.f32 1.0, %v1944_v49 }
 0x1e7   :  { %v1142_v56 = vsel %vm1141_vm15, %v1942_v35, %v1138_v50  ;;  %v1150_v16 = vmul.f32 %v1946_v53, %v1013_v37  ;;  %1947 = vpow2.f32 %v1842_v52  ;;  %1821 = vmatmul.msk.f32.gmra.mxu2 %vm435_vm1, %v623_v51  ;;  %vm1155_vm2 = vweird.f32 %v1946_v53 }
 0x1e8   :  { %v1147_v57 = vsel %vm1144_vm0, %v1146_v54, %v1142_v56  ;;  %1949 = vrcp.f32 %v1014_v55  ;;  %vm1156_vm4 = vmor %vm1154_vm3, %vm1155_vm2  ;;  %v1175_v13 = vand.u32 2147483648, %v1014_v55  ;;  %v1173_v17 = vand.u32 2147483647, %v1014_v55 }
 0x1e9   :  { %1621 = vst.msk [vmem:[%s2580_s7 + $0x30] sm:$0xff] %vm1614_vm5, %v1147_v57  ;;  %v1151_v58 = vsub.f32 1.0, %v1150_v16  ;;  %vm1169_vm8 = vweird.f32 %v1014_v55 }
 0x1ea   :  { %v569_v61 = vpop.f32.mrf.mxu1  ;;  %v808_v62 = vpop.f32.mrf.mxu2  ;;  %v1176_v24 = vor.u32 1.1754944e-38, %v1175_v13  ;;  %vm1174_vm10 = vcmp.eq.f32.partialorder %v1173_v17, 8.507059e+37 }
 0x1eb   :  { %v1152_v63 = vmul.f32 %v1946_v53, %v1151_v58  ;;  %v570_v0 = vadd.f32 %v2259_v31, %v569_v61  ;;  %v809_v1 = vadd.f32 %v2323_v19, %v808_v62 }
 0x1ed   :  { %v1948_v2 = vpop.eup %1947  ;;  %v1153_v3 = vadd.f32 %v1946_v53, %v1152_v63  ;;  %v624_v4 = vmax.f32 %v570_v0, 0.0  ;;  %v1843_v5 = vmul.f32 -1.442695, %v809_v1 }
 0x1ee   :  { %v1950_v6 = vpop.eup %1949  ;;  %v1015_v8 = vadd.f32 1.0, %v1948_v2 }
 0x1ef   :  { %v1157_v9 = vsel %vm1156_vm4, %v1946_v53, %v1153_v3  ;;  %v1165_v10 = vmul.f32 %v1950_v6, %v1014_v55  ;;  %1951 = vpow2.f32 %v1843_v5  ;;  %1822 = vmatmul.msk.f32.gmra.mxu2 %vm435_vm1, %v624_v4  ;;  %vm1170_vm7 = vweird.f32 %v1950_v6 }
 0x1f0   :  { %v1162_v11 = vsel %vm1159_vm6, %v1161_v7, %v1157_v9  ;;  %1953 = vrcp.f32 %v1015_v8  ;;  %vm1171_vm9 = vmor %vm1169_vm8, %vm1170_vm7  ;;  %v1188_v33 = vand.u32 2147483647, %v1015_v8  ;;  %v1190_v34 = vand.u32 2147483648, %v1015_v8 }
 0x1f1   :  { %1622 = vst.msk [vmem:[%s2580_s7 + $0x38] sm:$0xff] %vm1614_vm5, %v1162_v11  ;;  %v1166_v12 = vsub.f32 1.0, %v1165_v10  ;;  %vm1184_vm12 = vweird.f32 %v1015_v8 }
 0x1f2   :  { %v811_v14 = vpop.f32.mrf.mxu2  ;;  %v1191_v43 = vor.u32 1.1754944e-38, %v1190_v34  ;;  %vm1189_vm14 = vcmp.eq.f32.partialorder %v1188_v33, 8.507059e+37 }
 0x1f3   :  { %v1167_v15 = vmul.f32 %v1950_v6, %v1166_v12  ;;  %v812_v18 = vadd.f32 %v2323_v19, %v811_v14 }
 0x1f5   :  { %v1952_v20 = vpop.eup %1951  ;;  %v1168_v21 = vadd.f32 %v1950_v6, %v1167_v15  ;;  %v1844_v22 = vmul.f32 -1.442695, %v812_v18 }
 0x1f6   :  { %v1954_v23 = vpop.eup %1953  ;;  %v1016_v25 = vadd.f32 1.0, %v1952_v20 }
 0x1f7   :  { %v1172_v26 = vsel %vm1171_vm9, %v1950_v6, %v1168_v21  ;;  %v1180_v27 = vmul.f32 %v1954_v23, %v1015_v8  ;;  %1955 = vpow2.f32 %v1844_v22  ;;  %vm1185_vm11 = vweird.f32 %v1954_v23 }
 0x1f8   :  { %v1177_v28 = vsel %vm1174_vm10, %v1176_v24, %v1172_v26  ;;  %1957 = vrcp.f32 %v1016_v25  ;;  %v572_v29 = vpop.f32.mrf.mxu3  ;;  %vm1186_vm13 = vmor %vm1184_vm12, %vm1185_vm11  ;;  %v1203_v51 = vand.u32 2147483647, %v1016_v25  ;;  %v1205_v52 = vand.u32 2147483648, %v1016_v25 }
 0x1f9   :  { %1623 = vst.msk [vmem:[%s2580_s7 + $0x40] sm:$0xff] %vm1614_vm5, %v1177_v28  ;;  %v1181_v30 = vsub.f32 1.0, %v1180_v27  ;;  %v573_v32 = vadd.f32 %v2259_v31, %v572_v29  ;;  %vm1199_vm0 = vweird.f32 %v1016_v25 }
 0x1fa   :  { %v814_v35 = vpop.f32.mrf.mxu2  ;;  %v1206_v60 = vor.u32 1.1754944e-38, %v1205_v52  ;;  %vm1204_vm3 = vcmp.eq.f32.partialorder %v1203_v51, 8.507059e+37 }
 0x1fb   :  { %v1182_v36 = vmul.f32 %v1954_v23, %v1181_v30  ;;  %v625_v37 = vmax.f32 %v573_v32, 0.0  ;;  %v815_v38 = vadd.f32 %v2323_v19, %v814_v35 }
 0x1fd   :  { %v1956_v39 = vpop.eup %1955  ;;  %v1183_v40 = vadd.f32 %v1954_v23, %v1182_v36  ;;  %v1845_v41 = vmul.f32 -1.442695, %v815_v38  ;;  %1823 = vmatmul.msk.f32.gmra.mxu2 %vm435_vm1, %v625_v37 }
 0x1fe   :  { %v1958_v42 = vpop.eup %1957  ;;  %v1017_v44 = vadd.f32 1.0, %v1956_v39 }
 0x1ff   :  { %v1187_v45 = vsel %vm1186_vm13, %v1954_v23, %v1183_v40  ;;  %v1195_v46 = vmul.f32 %v1958_v42, %v1016_v25  ;;  %1959 = vpow2.f32 %v1845_v41  ;;  %vm1200_vm15 = vweird.f32 %v1958_v42  ;;  %v2432_v41 = vld [vmem:[%s2577_s4] ss:$0 sm:$0xff] }
 0x200   :  { %v1192_v47 = vsel %vm1189_vm14, %v1191_v43, %v1187_v45  ;;  %1961 = vrcp.f32 %v1017_v44  ;;  %v574_v48 = vpop.f32.mrf.mxu3  ;;  %vm1201_vm2 = vmor %vm1199_vm0, %vm1200_vm15  ;;  %v1218_v4 = vand.u32 2147483647, %v1017_v44  ;;  %v1220_v5 = vand.u32 2147483648, %v1017_v44 }
 0x201   :  { %1624 = vst.msk [vmem:[%s2580_s7 + $0x48] sm:$0xff] %vm1614_vm5, %v1192_v47  ;;  %v1196_v49 = vsub.f32 1.0, %v1195_v46  ;;  %v575_v50 = vadd.f32 %v2259_v31, %v574_v48  ;;  %vm1214_vm6 = vweird.f32 %v1017_v44 }
 0x202   :  { %v817_v53 = vpop.f32.mrf.mxu2  ;;  %v1221_v14 = vor.u32 1.1754944e-38, %v1220_v5  ;;  %vm1219_vm8 = vcmp.eq.f32.partialorder %v1218_v4, 8.507059e+37 }
 0x203   :  { %v1197_v54 = vmul.f32 %v1958_v42, %v1196_v49  ;;  %v626_v55 = vmax.f32 %v575_v50, 0.0  ;;  %v818_v56 = vadd.f32 %v2323_v19, %v817_v53 }
 0x205   :  { %v1960_v16 = vpop.eup %1959  ;;  %v1198_v57 = vadd.f32 %v1958_v42, %v1197_v54  ;;  %v1846_v58 = vmul.f32 -1.442695, %v818_v56  ;;  %1824 = vmatmul.msk.f32.vlgmr.msra.gmra.mxu3 %vm435_vm1, %v626_v55 }
 0x206   :  { %v1962_v59 = vpop.eup %1961  ;;  %v1018_v61 = vadd.f32 1.0, %v1960_v16 }
 0x207   :  { %v1202_v62 = vsel %vm1201_vm2, %v1958_v42, %v1198_v57  ;;  %v1210_v63 = vmul.f32 %v1962_v59, %v1017_v44  ;;  %1963 = vpow2.f32 %v1846_v58  ;;  %vm1215_vm4 = vweird.f32 %v1962_v59 }
 0x208   :  { %v1207_v0 = vsel %vm1204_vm3, %v1206_v60, %v1202_v62  ;;  %1965 = vrcp.f32 %v1018_v61  ;;  %v577_v1 = vpop.f32.mrf.mxu3  ;;  %vm1216_vm7 = vmor %vm1214_vm6, %vm1215_vm4  ;;  %v1233_v24 = vand.u32 2147483647, %v1018_v61  ;;  %v1235_v25 = vand.u32 2147483648, %v1018_v61 }
 0x209   :  { %1625 = vst.msk [vmem:[%s2580_s7 + $0x50] sm:$0xff] %vm1614_vm5, %v1207_v0  ;;  %v1211_v2 = vsub.f32 1.0, %v1210_v63  ;;  %v578_v3 = vadd.f32 %v2259_v31, %v577_v1  ;;  %vm1229_vm10 = vweird.f32 %v1018_v61 }
 0x20a   :  { %v820_v6 = vpop.f32.mrf.mxu2  ;;  %v1236_v35 = vor.u32 1.1754944e-38, %v1235_v25  ;;  %vm1234_vm12 = vcmp.eq.f32.partialorder %v1233_v24, 8.507059e+37 }
 0x20b   :  { %v1212_v7 = vmul.f32 %v1962_v59, %v1211_v2  ;;  %v627_v8 = vmax.f32 %v578_v3, 0.0  ;;  %v821_v9 = vadd.f32 %v2323_v19, %v820_v6 }
 0x20d   :  { %v1964_v10 = vpop.eup %1963  ;;  %v1213_v11 = vadd.f32 %v1962_v59, %v1212_v7  ;;  %v1847_v12 = vmul.f32 -1.442695, %v821_v9  ;;  %1825 = vmatmul.msk.f32.gmra.mxu3 %vm435_vm1, %v627_v8 }
 0x20e   :  { %v1966_v13 = vpop.eup %1965  ;;  %v1019_v15 = vadd.f32 1.0, %v1964_v10 }
 0x20f   :  { %v1217_v17 = vsel %vm1216_vm7, %v1962_v59, %v1213_v11  ;;  %v1225_v18 = vmul.f32 %v1966_v13, %v1018_v61  ;;  %1967 = vpow2.f32 %v1847_v12  ;;  %vm1230_vm9 = vweird.f32 %v1966_v13 }
 0x210   :  { %v1222_v20 = vsel %vm1219_vm8, %v1221_v14, %v1217_v17  ;;  %1969 = vrcp.f32 %v1019_v15  ;;  %v579_v21 = vpop.f32.mrf.mxu3  ;;  %vm1231_vm11 = vmor %vm1229_vm10, %vm1230_vm9  ;;  %v1248_v43 = vand.u32 2147483647, %v1019_v15  ;;  %v1250_v44 = vand.u32 2147483648, %v1019_v15 }
 0x211   :  { %1626 = vst.msk [vmem:[%s2580_s7 + $0x58] sm:$0xff] %vm1614_vm5, %v1222_v20  ;;  %v1226_v22 = vsub.f32 1.0, %v1225_v18  ;;  %v580_v23 = vadd.f32 %v2259_v31, %v579_v21  ;;  %vm1244_vm14 = vweird.f32 %v1019_v15 }
 0x212   :  { %v823_v26 = vpop.f32.mrf.mxu2  ;;  %v1251_v53 = vor.u32 1.1754944e-38, %v1250_v44  ;;  %vm1249_vm0 = vcmp.eq.f32.partialorder %v1248_v43, 8.507059e+37 }
 0x213   :  { %v1227_v27 = vmul.f32 %v1966_v13, %v1226_v22  ;;  %v628_v28 = vmax.f32 %v580_v23, 0.0  ;;  %v824_v29 = vadd.f32 %v2323_v19, %v823_v26 }
 0x215   :  { %v1968_v30 = vpop.eup %1967  ;;  %v1228_v32 = vadd.f32 %v1966_v13, %v1227_v27  ;;  %v1848_v33 = vmul.f32 -1.442695, %v824_v29  ;;  %1826 = vmatmul.msk.f32.gmra.mxu3 %vm435_vm1, %v628_v28 }
 0x216   :  { %v1970_v34 = vpop.eup %1969  ;;  %v1020_v36 = vadd.f32 1.0, %v1968_v30 }
 0x217   :  { %v1232_v37 = vsel %vm1231_vm11, %v1966_v13, %v1228_v32  ;;  %v1240_v31 = vmul.f32 %v1970_v34, %v1019_v15  ;;  %1971 = vpow2.f32 %v1848_v33  ;;  %vm1245_vm13 = vweird.f32 %v1970_v34 }
 0x218   :  { %v1237_v38 = vsel %vm1234_vm12, %v1236_v35, %v1232_v37  ;;  %1973 = vrcp.f32 %v1020_v36  ;;  %v582_v39 = vpop.f32.mrf.mxu3  ;;  %vm1246_vm15 = vmor %vm1244_vm14, %vm1245_vm13  ;;  %v1263_v60 = vand.u32 2147483647, %v1020_v36  ;;  %v1265_v61 = vand.u32 2147483648, %v1020_v36 }
 0x219   :  { %1627 = vst.msk [vmem:[%s2580_s7 + $0x60] sm:$0xff] %vm1614_vm5, %v1237_v38  ;;  %v1241_v40 = vsub.f32 1.0, %v1240_v31  ;;  %v583_v42 = vadd.f32 %v2432_v41, %v582_v39  ;;  %vm1259_vm3 = vweird.f32 %v1020_v36 }
 0x21a   :  { %v826_v45 = vpop.f32.mrf.mxu2  ;;  %v1266_v6 = vor.u32 1.1754944e-38, %v1265_v61  ;;  %vm1264_vm6 = vcmp.eq.f32.partialorder %v1263_v60, 8.507059e+37 }
 0x21b   :  { %v1242_v46 = vmul.f32 %v1970_v34, %v1241_v40  ;;  %v629_v47 = vmax.f32 %v583_v42, 0.0  ;;  %v827_v48 = vadd.f32 %v2323_v19, %v826_v45 }
 0x21d   :  { %v1972_v49 = vpop.eup %1971  ;;  %v1243_v50 = vadd.f32 %v1970_v34, %v1242_v46  ;;  %v1849_v51 = vmul.f32 -1.442695, %v827_v48  ;;  %1827 = vmatmul.msk.f32.gmra.mxu3 %vm435_vm1, %v629_v47 }
 0x21e   :  { %v1974_v52 = vpop.eup %1973  ;;  %v1021_v54 = vadd.f32 1.0, %v1972_v49 }
 0x21f   :  { %v1247_v55 = vsel %vm1246_vm15, %v1970_v34, %v1243_v50  ;;  %v1255_v56 = vmul.f32 %v1974_v52, %v1020_v36  ;;  %1975 = vpow2.f32 %v1849_v51  ;;  %vm1260_vm2 = vweird.f32 %v1974_v52 }
 0x220   :  { %v1252_v16 = vsel %vm1249_vm0, %v1251_v53, %v1247_v55  ;;  %1977 = vrcp.f32 %v1021_v54  ;;  %v584_v57 = vpop.f32.mrf.mxu3  ;;  %vm1261_vm4 = vmor %vm1259_vm3, %vm1260_vm2  ;;  %v1278_v14 = vand.u32 2147483647, %v1021_v54  ;;  %v1280_v15 = vand.u32 2147483648, %v1021_v54 }
 0x221   :  { %1628 = vst.msk [vmem:[%s2580_s7 + $0x68] sm:$0xff] %vm1614_vm5, %v1252_v16  ;;  %v1256_v58 = vsub.f32 1.0, %v1255_v56  ;;  %v585_v59 = vadd.f32 %v2432_v41, %v584_v57  ;;  %vm1274_vm8 = vweird.f32 %v1021_v54 }
 0x222   :  { %v829_v62 = vpop.f32.mrf.mxu2  ;;  %v1281_v26 = vor.u32 1.1754944e-38, %v1280_v15  ;;  %vm1279_vm10 = vcmp.eq.f32.partialorder %v1278_v14, 8.507059e+37 }
 0x223   :  { %v1257_v63 = vmul.f32 %v1974_v52, %v1256_v58  ;;  %v630_v0 = vmax.f32 %v585_v59, 0.0  ;;  %v830_v1 = vadd.f32 %v2323_v19, %v829_v62 }
 0x225   :  { %v1976_v2 = vpop.eup %1975  ;;  %v1258_v3 = vadd.f32 %v1974_v52, %v1257_v63  ;;  %v1850_v4 = vmul.f32 -1.442695, %v830_v1  ;;  %1828 = vmatmul.msk.f32.gmra.mxu3 %vm435_vm1, %v630_v0 }
 0x226   :  { %v1978_v5 = vpop.eup %1977  ;;  %v1022_v7 = vadd.f32 1.0, %v1976_v2 }
 0x227   :  { %v1262_v8 = vsel %vm1261_vm4, %v1974_v52, %v1258_v3  ;;  %v1270_v9 = vmul.f32 %v1978_v5, %v1021_v54  ;;  %1979 = vpow2.f32 %v1850_v4  ;;  %vm1275_vm7 = vweird.f32 %v1978_v5 }
 0x228   :  { %v1267_v10 = vsel %vm1264_vm6, %v1266_v6, %v1262_v8  ;;  %1981 = vrcp.f32 %v1022_v7  ;;  %v587_v11 = vpop.f32.mrf.mxu3  ;;  %vm1276_vm9 = vmor %vm1274_vm8, %vm1275_vm7  ;;  %v1293_v35 = vand.u32 2147483647, %v1022_v7  ;;  %v1295_v36 = vand.u32 2147483648, %v1022_v7 }
 0x229   :  { %1629 = vst.msk [vmem:[%s2580_s7 + $0x70] sm:$0xff] %vm1614_vm5, %v1267_v10  ;;  %v1271_v12 = vsub.f32 1.0, %v1270_v9  ;;  %v588_v13 = vadd.f32 %v2432_v41, %v587_v11  ;;  %vm1289_vm12 = vweird.f32 %v1022_v7  ;;  %v2473_v10 = vld [vmem:[%s2579_s6] ss:$0 sm:$0xff] }
 0x22a   :  { %v832_v17 = vpop.f32.mrf.mxu2  ;;  %v1296_v45 = vor.u32 1.1754944e-38, %v1295_v36  ;;  %vm1294_vm14 = vcmp.eq.f32.partialorder %v1293_v35, 8.507059e+37 }
 0x22b   :  { %v1272_v18 = vmul.f32 %v1978_v5, %v1271_v12  ;;  %v631_v20 = vmax.f32 %v588_v13, 0.0  ;;  %v833_v21 = vadd.f32 %v2323_v19, %v832_v17 }
 0x22d   :  { %v1980_v22 = vpop.eup %1979  ;;  %v1273_v23 = vadd.f32 %v1978_v5, %v1272_v18  ;;  %v1851_v24 = vmul.f32 -1.442695, %v833_v21  ;;  %1829 = vmatmul.msk.f32.gmra.mxu3 %vm435_vm1, %v631_v20 }
 0x22e   :  { %v1982_v25 = vpop.eup %1981  ;;  %v1023_v27 = vadd.f32 1.0, %v1980_v22 }
 0x22f   :  { %v1277_v28 = vsel %vm1276_vm9, %v1978_v5, %v1273_v23  ;;  %v1285_v29 = vmul.f32 %v1982_v25, %v1022_v7  ;;  %1983 = vpow2.f32 %v1851_v24  ;;  %vm1290_vm11 = vweird.f32 %v1982_v25 }
 0x230   :  { %v1282_v30 = vsel %vm1279_vm10, %v1281_v26, %v1277_v28  ;;  %1985 = vrcp.f32 %v1023_v27  ;;  %v589_v32 = vpop.f32.mrf.mxu3  ;;  %vm1291_vm13 = vmor %vm1289_vm12, %vm1290_vm11  ;;  %v1308_v53 = vand.u32 2147483647, %v1023_v27  ;;  %v1310_v54 = vand.u32 2147483648, %v1023_v27 }
 0x231   :  { %1630 = vst.msk [vmem:[%s2580_s7 + $0x78] sm:$0xff] %vm1614_vm5, %v1282_v30  ;;  %v1286_v33 = vsub.f32 1.0, %v1285_v29  ;;  %v590_v34 = vadd.f32 %v2432_v41, %v589_v32  ;;  %vm1304_vm0 = vweird.f32 %v1023_v27 }
 0x232   :  { %v835_v37 = vpop.f32.mrf.mxu2  ;;  %v1311_v62 = vor.u32 1.1754944e-38, %v1310_v54  ;;  %vm1309_vm3 = vcmp.eq.f32.partialorder %v1308_v53, 8.507059e+37 }
 0x233   :  { %v1287_v31 = vmul.f32 %v1982_v25, %v1286_v33  ;;  %v632_v38 = vmax.f32 %v590_v34, 0.0  ;;  %v836_v39 = vadd.f32 %v2323_v19, %v835_v37 }
 0x235   :  { %v1984_v40 = vpop.eup %1983  ;;  %v1288_v42 = vadd.f32 %v1982_v25, %v1287_v31  ;;  %v1852_v43 = vmul.f32 -1.442695, %v836_v39  ;;  %1830 = vmatmul.msk.f32.gmra.mxu3 %vm435_vm1, %v632_v38 }
 0x236   :  { %v1986_v44 = vpop.eup %1985  ;;  %v1024_v46 = vadd.f32 1.0, %v1984_v40 }
 0x237   :  { %v1292_v47 = vsel %vm1291_vm13, %v1982_v25, %v1288_v42  ;;  %v1300_v48 = vmul.f32 %v1986_v44, %v1023_v27  ;;  %1987 = vpow2.f32 %v1852_v43  ;;  %vm1305_vm15 = vweird.f32 %v1986_v44 }
 0x238   :  { %v1297_v49 = vsel %vm1294_vm14, %v1296_v45, %v1292_v47  ;;  %1989 = vrcp.f32 %v1024_v46  ;;  %v592_v50 = vpop.f32.mrf.mxu3  ;;  %vm1306_vm2 = vmor %vm1304_vm0, %vm1305_vm15  ;;  %v1323_v5 = vand.u32 2147483647, %v1024_v46  ;;  %v1325_v6 = vand.u32 2147483648, %v1024_v46 }
 0x239   :  { %1631 = vst.msk [vmem:[%s2580_s7 + $0x80] sm:$0xff] %vm1614_vm5, %v1297_v49  ;;  %v1301_v51 = vsub.f32 1.0, %v1300_v48  ;;  %v593_v52 = vadd.f32 %v2432_v41, %v592_v50  ;;  %vm1319_vm6 = vweird.f32 %v1024_v46 }
 0x23a   :  { %v838_v55 = vpop.f32.mrf.mxu2  ;;  %v1326_v15 = vor.u32 1.1754944e-38, %v1325_v6  ;;  %vm1324_vm8 = vcmp.eq.f32.partialorder %v1323_v5, 8.507059e+37 }
 0x23b   :  { %v1302_v56 = vmul.f32 %v1986_v44, %v1301_v51  ;;  %v633_v16 = vmax.f32 %v593_v52, 0.0  ;;  %v839_v57 = vadd.f32 %v2323_v19, %v838_v55 }
 0x23d   :  { %v1988_v58 = vpop.eup %1987  ;;  %v1303_v59 = vadd.f32 %v1986_v44, %v1302_v56  ;;  %v1853_v60 = vmul.f32 -1.442695, %v839_v57  ;;  %1831 = vmatmul.msk.f32.gmra.mxu3 %vm435_vm1, %v633_v16 }
 0x23e   :  { %v1990_v61 = vpop.eup %1989  ;;  %v1025_v63 = vadd.f32 1.0, %v1988_v58 }
 0x23f   :  { %v1307_v0 = vsel %vm1306_vm2, %v1986_v44, %v1303_v59  ;;  %v1315_v1 = vmul.f32 %v1990_v61, %v1024_v46  ;;  %1991 = vpow2.f32 %v1853_v60  ;;  %vm1320_vm4 = vweird.f32 %v1990_v61 }
 0x240   :  { %v1312_v2 = vsel %vm1309_vm3, %v1311_v62, %v1307_v0  ;;  %1993 = vrcp.f32 %v1025_v63  ;;  %v594_v3 = vpop.f32.mrf.mxu3  ;;  %vm1321_vm7 = vmor %vm1319_vm6, %vm1320_vm4  ;;  %v1340_v23 = vand.u32 2147483648, %v1025_v63  ;;  %v1338_v26 = vand.u32 2147483647, %v1025_v63 }
 0x241   :  { %1632 = vst.msk [vmem:[%s2580_s7 + $0x88] sm:$0xff] %vm1614_vm5, %v1312_v2  ;;  %v1316_v19 = vsub.f32 1.0, %v1315_v1  ;;  %v595_v4 = vadd.f32 %v2432_v41, %v594_v3  ;;  %vm1334_vm9 = vweird.f32 %v1025_v63 }
 0x242   :  { %v841_v7 = vpop.f32.mrf.mxu2  ;;  %v1341_v33 = vor.u32 1.1754944e-38, %v1340_v23  ;;  %vm1339_vm11 = vcmp.eq.f32.partialorder %v1338_v26, 8.507059e+37 }
 0x243   :  { %v1317_v8 = vmul.f32 %v1990_v61, %v1316_v19  ;;  %v634_v9 = vmax.f32 %v595_v4, 0.0  ;;  %v842_v11 = vadd.f32 %v2473_v10, %v841_v7 }
 0x245   :  { %v1992_v12 = vpop.eup %1991  ;;  %v1318_v13 = vadd.f32 %v1990_v61, %v1317_v8  ;;  %v1854_v14 = vmul.f32 -1.442695, %v842_v11  ;;  %1832 = vmatmul.msk.f32.gmra.mxu3 %vm435_vm1, %v634_v9 }
 0x246   :  { %v1994_v41 = vpop.eup %1993  ;;  %v1026_v17 = vadd.f32 1.0, %v1992_v12 }
 0x247   :  { %v1322_v18 = vsel %vm1321_vm7, %v1990_v61, %v1318_v13  ;;  %v1330_v20 = vmul.f32 %v1994_v41, %v1025_v63  ;;  %1995 = vpow2.f32 %v1854_v14  ;;  %vm1335_vm1 = vweird.f32 %v1994_v41 }
 0x248   :  { %v1327_v21 = vsel %vm1324_vm8, %v1326_v15, %v1322_v18  ;;  %1997 = vrcp.f32 %v1026_v17  ;;  %vm1336_vm10 = vmor %vm1334_vm9, %vm1335_vm1  ;;  %v1355_v38 = vand.u32 2147483648, %v1026_v17  ;;  %v1353_v42 = vand.u32 2147483647, %v1026_v17 }
 0x249   :  { %1633 = vst.msk [vmem:[%s2580_s7 + $0x90] sm:$0xff] %vm1614_vm5, %v1327_v21  ;;  %v1331_v22 = vsub.f32 1.0, %v1330_v20  ;;  %vm1349_vm13 = vweird.f32 %v1026_v17 }
 0x24a   :  { %v844_v24 = vpop.f32.mrf.mxu2  ;;  %v1356_v48 = vor.u32 1.1754944e-38, %v1355_v38  ;;  %vm1354_vm15 = vcmp.eq.f32.partialorder %v1353_v42, 8.507059e+37 }
 0x24b   :  { %v1332_v25 = vmul.f32 %v1994_v41, %v1331_v22  ;;  %v845_v27 = vadd.f32 %v2473_v10, %v844_v24 }
 0x24d   :  { %v1996_v28 = vpop.eup %1995  ;;  %v1333_v29 = vadd.f32 %v1994_v41, %v1332_v25  ;;  %v1855_v30 = vmul.f32 -1.442695, %v845_v27 }
 0x24e   :  { %v1998_v32 = vpop.eup %1997  ;;  %v1027_v34 = vadd.f32 1.0, %v1996_v28 }
 0x24f   :  { %v1337_v35 = vsel %vm1336_vm10, %v1994_v41, %v1333_v29  ;;  %v1345_v36 = vmul.f32 %v1998_v32, %v1026_v17  ;;  %1999 = vpow2.f32 %v1855_v30  ;;  %vm1350_vm12 = vweird.f32 %v1998_v32 }
 0x250   :  { %v1342_v37 = vsel %vm1339_vm11, %v1341_v33, %v1337_v35  ;;  %2001 = vrcp.f32 %v1027_v34  ;;  %vm1351_vm14 = vmor %vm1349_vm13, %vm1350_vm12  ;;  %v1370_v54 = vand.u32 2147483648, %v1027_v34  ;;  %v1368_v16 = vand.u32 2147483647, %v1027_v34 }
 0x251   :  { %1634 = vst.msk [vmem:[%s2580_s7 + $0x98] sm:$0xff] %vm1614_vm5, %v1342_v37  ;;  %v1346_v31 = vsub.f32 1.0, %v1345_v36  ;;  %vm1364_vm2 = vweird.f32 %v1027_v34 }
 0x252   :  { %v847_v39 = vpop.f32.mrf.mxu2  ;;  %v1371_v62 = vor.u32 1.1754944e-38, %v1370_v54  ;;  %vm1369_vm4 = vcmp.eq.f32.partialorder %v1368_v16, 8.507059e+37 }
 0x253   :  { %v1347_v40 = vmul.f32 %v1998_v32, %v1346_v31  ;;  %v848_v43 = vadd.f32 %v2473_v10, %v847_v39 }
 0x255   :  { %v2000_v44 = vpop.eup %1999  ;;  %v1348_v45 = vadd.f32 %v1998_v32, %v1347_v40  ;;  %v1856_v46 = vmul.f32 -1.442695, %v848_v43 }
 0x256   :  { %v2002_v47 = vpop.eup %2001  ;;  %v1028_v49 = vadd.f32 1.0, %v2000_v44 }
 0x257   :  { %v1352_v50 = vsel %vm1351_vm14, %v1998_v32, %v1348_v45  ;;  %v1360_v51 = vmul.f32 %v2002_v47, %v1027_v34  ;;  %2003 = vpow2.f32 %v1856_v46  ;;  %vm1365_vm0 = vweird.f32 %v2002_v47 }
 0x258   :  { %v1357_v52 = vsel %vm1354_vm15, %v1356_v48, %v1352_v50  ;;  %2005 = vrcp.f32 %v1028_v49  ;;  %vm1366_vm3 = vmor %vm1364_vm2, %vm1365_vm0  ;;  %v1385_v19 = vand.u32 2147483648, %v1028_v49  ;;  %v1383_v6 = vand.u32 2147483647, %v1028_v49 }
 0x259   :  { %1635 = vst.msk [vmem:[%s2580_s7 + $0xa0] sm:$0xff] %vm1614_vm5, %v1357_v52  ;;  %v1361_v53 = vsub.f32 1.0, %v1360_v51  ;;  %vm1379_vm7 = vweird.f32 %v1028_v49 }
 0x25a   :  { %v850_v55 = vpop.f32.mrf.mxu2  ;;  %v1386_v13 = vor.u32 1.1754944e-38, %v1385_v19  ;;  %vm1384_vm1 = vcmp.eq.f32.partialorder %v1383_v6, 8.507059e+37 }
 0x25b   :  { %v1362_v56 = vmul.f32 %v2002_v47, %v1361_v53  ;;  %v851_v57 = vadd.f32 %v2473_v10, %v850_v55 }
 0x25d   :  { %v2004_v58 = vpop.eup %2003  ;;  %v1363_v59 = vadd.f32 %v2002_v47, %v1362_v56  ;;  %v1857_v60 = vmul.f32 -1.442695, %v851_v57 }
 0x25e   :  { %v2006_v61 = vpop.eup %2005  ;;  %v1029_v63 = vadd.f32 1.0, %v2004_v58 }
 0x25f   :  { %v1367_v0 = vsel %vm1366_vm3, %v2002_v47, %v1363_v59  ;;  %v1375_v1 = vmul.f32 %v2006_v61, %v1028_v49  ;;  %2007 = vpow2.f32 %v1857_v60  ;;  %vm1380_vm6 = vweird.f32 %v2006_v61 }
 0x260   :  { %v1372_v2 = vsel %vm1369_vm4, %v1371_v62, %v1367_v0  ;;  %2009 = vrcp.f32 %v1029_v63  ;;  %vm1381_vm8 = vmor %vm1379_vm7, %vm1380_vm6  ;;  %v1400_v20 = vand.u32 2147483648, %v1029_v63  ;;  %v1398_v23 = vand.u32 2147483647, %v1029_v63 }
 0x261   :  { %1636 = vst.msk [vmem:[%s2580_s7 + $0xa8] sm:$0xff] %vm1614_vm5, %v1372_v2  ;;  %v1376_v3 = vsub.f32 1.0, %v1375_v1  ;;  %vm1394_vm10 = vweird.f32 %v1029_v63 }
 0x262   :  { %v853_v4 = vpop.f32.mrf.mxu2  ;;  %v1401_v29 = vor.u32 1.1754944e-38, %v1400_v20  ;;  %vm1399_vm12 = vcmp.eq.f32.partialorder %v1398_v23, 8.507059e+37 }
 0x263   :  { %v1377_v5 = vmul.f32 %v2006_v61, %v1376_v3  ;;  %v854_v7 = vadd.f32 %v2473_v10, %v853_v4 }
 0x265   :  { %v2008_v8 = vpop.eup %2007  ;;  %v1378_v9 = vadd.f32 %v2006_v61, %v1377_v5  ;;  %v1858_v11 = vmul.f32 -1.442695, %v854_v7 }
 0x266   :  { %v2010_v12 = vpop.eup %2009  ;;  %v1030_v14 = vadd.f32 1.0, %v2008_v8 }
 0x267   :  { %v1382_v41 = vsel %vm1381_vm8, %v2006_v61, %v1378_v9  ;;  %v1390_v15 = vmul.f32 %v2010_v12, %v1029_v63  ;;  %2011 = vpow2.f32 %v1858_v11  ;;  %vm1395_vm9 = vweird.f32 %v2010_v12 }
 0x268   :  { %v1387_v17 = vsel %vm1384_vm1, %v1386_v13, %v1382_v41  ;;  %2013 = vrcp.f32 %v1030_v14  ;;  %vm1396_vm11 = vmor %vm1394_vm10, %vm1395_vm9  ;;  %v1415_v36 = vand.u32 2147483648, %v1030_v14  ;;  %v1413_v38 = vand.u32 2147483647, %v1030_v14 }
 0x269   :  { %1637 = vst.msk [vmem:[%s2580_s7 + $0xb0] sm:$0xff] %vm1614_vm5, %v1387_v17  ;;  %v1391_v18 = vsub.f32 1.0, %v1390_v15  ;;  %vm1409_vm14 = vweird.f32 %v1030_v14 }
 0x26a   :  { %v856_v21 = vpop.f32.mrf.mxu2  ;;  %v1416_v45 = vor.u32 1.1754944e-38, %v1415_v36  ;;  %vm1414_vm0 = vcmp.eq.f32.partialorder %v1413_v38, 8.507059e+37 }
 0x26b   :  { %v1392_v22 = vmul.f32 %v2010_v12, %v1391_v18  ;;  %v857_v24 = vadd.f32 %v2473_v10, %v856_v21 }
 0x26d   :  { %v2012_v25 = vpop.eup %2011  ;;  %v1393_v26 = vadd.f32 %v2010_v12, %v1392_v22  ;;  %v1859_v27 = vmul.f32 -1.442695, %v857_v24 }
 0x26e   :  { %v2014_v28 = vpop.eup %2013  ;;  %v1031_v30 = vadd.f32 1.0, %v2012_v25 }
 0x26f   :  { %v1397_v32 = vsel %vm1396_vm11, %v2010_v12, %v1393_v26  ;;  %v1405_v33 = vmul.f32 %v2014_v28, %v1030_v14  ;;  %2015 = vpow2.f32 %v1859_v27  ;;  %vm1410_vm13 = vweird.f32 %v2014_v28 }
 0x270   :  { %v1402_v34 = vsel %vm1399_vm12, %v1401_v29, %v1397_v32  ;;  %2017 = vrcp.f32 %v1031_v30  ;;  %vm1411_vm15 = vmor %vm1409_vm14, %vm1410_vm13  ;;  %v1430_v51 = vand.u32 2147483648, %v1031_v30  ;;  %v1428_v53 = vand.u32 2147483647, %v1031_v30 }
 0x271   :  { %1638 = vst.msk [vmem:[%s2580_s7 + $0xb8] sm:$0xff] %vm1614_vm5, %v1402_v34  ;;  %v1406_v35 = vsub.f32 1.0, %v1405_v33  ;;  %vm1424_vm3 = vweird.f32 %v1031_v30 }
 0x272   :  { %v859_v37 = vpop.f32.mrf.mxu2  ;;  %v1431_v16 = vor.u32 1.1754944e-38, %v1430_v51  ;;  %vm1429_vm6 = vcmp.eq.f32.partialorder %v1428_v53, 8.507059e+37 }
 0x273   :  { %v1407_v31 = vmul.f32 %v2014_v28, %v1406_v35  ;;  %v860_v39 = vadd.f32 %v2473_v10, %v859_v37 }
 0x275   :  { %v2016_v40 = vpop.eup %2015  ;;  %v1408_v42 = vadd.f32 %v2014_v28, %v1407_v31  ;;  %v1860_v43 = vmul.f32 -1.442695, %v860_v39 }
 0x276   :  { %v2018_v44 = vpop.eup %2017  ;;  %v1032_v46 = vadd.f32 1.0, %v2016_v40 }
 0x277   :  { %v1412_v47 = vsel %vm1411_vm15, %v2014_v28, %v1408_v42  ;;  %v1420_v48 = vmul.f32 %v2018_v44, %v1031_v30  ;;  %2019 = vpow2.f32 %v1860_v43  ;;  %vm1425_vm2 = vweird.f32 %v2018_v44 }
 0x278   :  { %v1417_v49 = vsel %vm1414_vm0, %v1416_v45, %v1412_v47  ;;  %2021 = vrcp.f32 %v1032_v46  ;;  %vm1426_vm4 = vmor %vm1424_vm3, %vm1425_vm2  ;;  %v1445_v0 = vand.u32 2147483648, %v1032_v46  ;;  %v1443_v2 = vand.u32 2147483647, %v1032_v46 }
 0x279   :  { %1639 = vst.msk [vmem:[%s2580_s7 + $0xc0] sm:$0xff] %vm1614_vm5, %v1417_v49  ;;  %v1421_v50 = vsub.f32 1.0, %v1420_v48  ;;  %vm1439_vm8 = vweird.f32 %v1032_v46 }
 0x27a   :  { %v1446_v5 = vor.u32 1.1754944e-38, %v1445_v0  ;;  %vm1444_vm9 = vcmp.eq.f32.partialorder %v1443_v2, 8.507059e+37 }
 0x27b   :  { %v1422_v52 = vmul.f32 %v2018_v44, %v1421_v50 }
 0x27d   :  { %v2020_v54 = vpop.eup %2019  ;;  %v1423_v55 = vadd.f32 %v2018_v44, %v1422_v52 }
 0x27e   :  { %v2022_v56 = vpop.eup %2021  ;;  %v1033_v57 = vadd.f32 1.0, %v2020_v54 }
 0x27f   :  { %v1427_v58 = vsel %vm1426_vm4, %v2018_v44, %v1423_v55  ;;  %v1435_v59 = vmul.f32 %v2022_v56, %v1032_v46  ;;  %vm1440_vm7 = vweird.f32 %v2022_v56 }
 0x280   :  { %v1432_v60 = vsel %vm1429_vm6, %v1431_v16, %v1427_v58  ;;  %2023 = vrcp.f32 %v1033_v57  ;;  %v862_v61 = vpop.f32.mrf.mxu2  ;;  %vm1441_vm1 = vmor %vm1439_vm8, %vm1440_vm7  ;;  %v1460_v13 = vand.u32 2147483648, %v1033_v57  ;;  %v1458_v15 = vand.u32 2147483647, %v1033_v57 }
 0x281   :  { %1640 = vst.msk [vmem:[%s2580_s7 + $0xc8] sm:$0xff] %vm1614_vm5, %v1432_v60  ;;  %v1436_v62 = vsub.f32 1.0, %v1435_v59  ;;  %v863_v63 = vadd.f32 %v2473_v10, %v862_v61  ;;  %vm1454_vm11 = vweird.f32 %v1033_v57 }
 0x282   :  { %v1461_v21 = vor.u32 1.1754944e-38, %v1460_v13  ;;  %vm1459_vm13 = vcmp.eq.f32.partialorder %v1458_v15, 8.507059e+37 }
 0x283   :  { %v1437_v1 = vmul.f32 %v2022_v56, %v1436_v62  ;;  %v1861_v3 = vmul.f32 -1.442695, %v863_v63 }
 0x285   :  { %v1438_v19 = vadd.f32 %v2022_v56, %v1437_v1  ;;  %2025 = vpow2.f32 %v1861_v3 }
 0x286   :  { %v2024_v4 = vpop.eup %2023 }
 0x287   :  { %v1442_v6 = vsel %vm1441_vm1, %v2022_v56, %v1438_v19  ;;  %v1450_v7 = vmul.f32 %v2024_v4, %v1033_v57  ;;  %vm1455_vm10 = vweird.f32 %v2024_v4 }
 0x288   :  { %v1447_v8 = vsel %vm1444_vm9, %v1446_v5, %v1442_v6  ;;  %v865_v9 = vpop.f32.mrf.mxu3  ;;  %vm1456_vm12 = vmor %vm1454_vm11, %vm1455_vm10 }
 0x289   :  { %1641 = vst.msk [vmem:[%s2580_s7 + $0xd0] sm:$0xff] %vm1614_vm5, %v1447_v8  ;;  %v1451_v11 = vsub.f32 1.0, %v1450_v7  ;;  %v866_v12 = vadd.f32 %v2473_v10, %v865_v9 }
 0x28b   :  { %v2026_v14 = vpop.eup %2025  ;;  %v1452_v41 = vmul.f32 %v2024_v4, %v1451_v11  ;;  %v1862_v17 = vmul.f32 -1.442695, %v866_v12 }
 0x28c   :  { %v1034_v18 = vadd.f32 1.0, %v2026_v14 }
 0x28d   :  { %v1453_v20 = vadd.f32 %v2024_v4, %v1452_v41  ;;  %2027 = vpow2.f32 %v1862_v17 }
 0x28e   :  { %2029 = vrcp.f32 %v1034_v18  ;;  %v1475_v33 = vand.u32 2147483648, %v1034_v18  ;;  %v1473_v36 = vand.u32 2147483647, %v1034_v18  ;;  %vm1469_vm15 = vweird.f32 %v1034_v18 }
 0x28f   :  { %v1457_v22 = vsel %vm1456_vm12, %v2024_v4, %v1453_v20 }
 0x290   :  { %v1462_v23 = vsel %vm1459_vm13, %v1461_v21, %v1457_v22  ;;  %v868_v24 = vpop.f32.mrf.mxu3  ;;  %v1476_v42 = vor.u32 1.1754944e-38, %v1475_v33  ;;  %vm1474_vm2 = vcmp.eq.f32.partialorder %v1473_v36, 8.507059e+37 }
 0x291   :  { %1642 = vst.msk [vmem:[%s2580_s7 + $0xd8] sm:$0xff] %vm1614_vm5, %v1462_v23  ;;  %v869_v25 = vadd.f32 %v2473_v10, %v868_v24 }
 0x293   :  { %v2028_v26 = vpop.eup %2027  ;;  %v1863_v27 = vmul.f32 -1.442695, %v869_v25 }
 0x294   :  { %v2030_v28 = vpop.eup %2029  ;;  %v1035_v29 = vadd.f32 1.0, %v2028_v26 }
 0x295   :  { %v1465_v30 = vmul.f32 %v2030_v28, %v1034_v18  ;;  %2031 = vpow2.f32 %v1863_v27  ;;  %vm1470_vm14 = vweird.f32 %v2030_v28 }
 0x296   :  { %2033 = vrcp.f32 %v1035_v29  ;;  %vm1471_vm0 = vmor %vm1469_vm15, %vm1470_vm14  ;;  %v1490_v48 = vand.u32 2147483648, %v1035_v29  ;;  %v1488_v51 = vand.u32 2147483647, %v1035_v29  ;;  %vm1484_vm4 = vweird.f32 %v1035_v29 }
 0x297   :  { %v1466_v32 = vsub.f32 1.0, %v1465_v30 }
 0x298   :  { %v871_v34 = vpop.f32.mrf.mxu3  ;;  %v1491_v16 = vor.u32 1.1754944e-38, %v1490_v48  ;;  %vm1489_vm7 = vcmp.eq.f32.partialorder %v1488_v51, 8.507059e+37 }
 0x299   :  { %v1467_v35 = vmul.f32 %v2030_v28, %v1466_v32  ;;  %v872_v37 = vadd.f32 %v2473_v10, %v871_v34 }
 0x29b   :  { %v2032_v31 = vpop.eup %2031  ;;  %v1468_v38 = vadd.f32 %v2030_v28, %v1467_v35  ;;  %v1864_v39 = vmul.f32 -1.442695, %v872_v37 }
 0x29c   :  { %v2034_v40 = vpop.eup %2033  ;;  %v1036_v43 = vadd.f32 1.0, %v2032_v31 }
 0x29d   :  { %v1472_v44 = vsel %vm1471_vm0, %v2030_v28, %v1468_v38  ;;  %v1480_v45 = vmul.f32 %v2034_v40, %v1035_v29  ;;  %2035 = vpow2.f32 %v1864_v39  ;;  %vm1485_vm3 = vweird.f32 %v2034_v40 }
 0x29e   :  { %v1477_v46 = vsel %vm1474_vm2, %v1476_v42, %v1472_v44  ;;  %2037 = vrcp.f32 %v1036_v43  ;;  %vm1486_vm6 = vmor %vm1484_vm4, %vm1485_vm3  ;;  %v1505_v62 = vand.u32 2147483648, %v1036_v43  ;;  %v1503_v1 = vand.u32 2147483647, %v1036_v43 }
 0x29f   :  { %1643 = vst.msk [vmem:[%s2580_s7 + $0xe0] sm:$0xff] %vm1614_vm5, %v1477_v46  ;;  %v1481_v47 = vsub.f32 1.0, %v1480_v45  ;;  %vm1499_vm1 = vweird.f32 %v1036_v43 }
 0x2a0   :  { %v874_v49 = vpop.f32.mrf.mxu3  ;;  %v1506_v6 = vor.u32 1.1754944e-38, %v1505_v62  ;;  %vm1504_vm10 = vcmp.eq.f32.partialorder %v1503_v1, 8.507059e+37 }
 0x2a1   :  { %v1482_v50 = vmul.f32 %v2034_v40, %v1481_v47  ;;  %v875_v52 = vadd.f32 %v2473_v10, %v874_v49 }
 0x2a3   :  { %v2036_v53 = vpop.eup %2035  ;;  %v1483_v54 = vadd.f32 %v2034_v40, %v1482_v50  ;;  %v1865_v55 = vmul.f32 -1.442695, %v875_v52 }
 0x2a4   :  { %v2038_v56 = vpop.eup %2037  ;;  %v1037_v57 = vadd.f32 1.0, %v2036_v53 }
 0x2a5   :  { %v1487_v58 = vsel %vm1486_vm6, %v2034_v40, %v1483_v54  ;;  %v1495_v59 = vmul.f32 %v2038_v56, %v1036_v43  ;;  %2039 = vpow2.f32 %v1865_v55  ;;  %vm1500_vm8 = vweird.f32 %v2038_v56 }
 0x2a6   :  { %v1492_v60 = vsel %vm1489_vm7, %v1491_v16, %v1487_v58  ;;  %2041 = vrcp.f32 %v1037_v57  ;;  %vm1501_vm9 = vmor %vm1499_vm1, %vm1500_vm8  ;;  %v1520_v13 = vand.u32 2147483648, %v1037_v57  ;;  %v1518_v15 = vand.u32 2147483647, %v1037_v57 }
 0x2a7   :  { %1644 = vst.msk [vmem:[%s2580_s7 + $0xe8] sm:$0xff] %vm1614_vm5, %v1492_v60  ;;  %v1496_v61 = vsub.f32 1.0, %v1495_v59  ;;  %vm1514_vm12 = vweird.f32 %v1037_v57 }
 0x2a8   :  { %v877_v63 = vpop.f32.mrf.mxu3  ;;  %v1521_v23 = vor.u32 1.1754944e-38, %v1520_v13  ;;  %vm1519_vm14 = vcmp.eq.f32.partialorder %v1518_v15, 8.507059e+37 }
 0x2a9   :  { %v1497_v0 = vmul.f32 %v2038_v56, %v1496_v61  ;;  %v878_v2 = vadd.f32 %v2473_v10, %v877_v63 }
 0x2ab   :  { %v2040_v3 = vpop.eup %2039  ;;  %v1498_v19 = vadd.f32 %v2038_v56, %v1497_v0  ;;  %v1866_v4 = vmul.f32 -1.442695, %v878_v2 }
 0x2ac   :  { %v2042_v5 = vpop.eup %2041  ;;  %v1038_v7 = vadd.f32 1.0, %v2040_v3 }
 0x2ad   :  { %v1502_v8 = vsel %vm1501_vm9, %v2038_v56, %v1498_v19  ;;  %v1510_v9 = vmul.f32 %v2042_v5, %v1037_v57  ;;  %2043 = vpow2.f32 %v1866_v4  ;;  %vm1515_vm11 = vweird.f32 %v2042_v5 }
 0x2ae   :  { %v1507_v11 = vsel %vm1504_vm10, %v1506_v6, %v1502_v8  ;;  %2045 = vrcp.f32 %v1038_v7  ;;  %vm1516_vm13 = vmor %vm1514_vm12, %vm1515_vm11  ;;  %v1535_v29 = vand.u32 2147483648, %v1038_v7  ;;  %v1533_v33 = vand.u32 2147483647, %v1038_v7 }
 0x2af   :  { %1645 = vst.msk [vmem:[%s2580_s7 + $0xf0] sm:$0xff] %vm1614_vm5, %v1507_v11  ;;  %v1511_v12 = vsub.f32 1.0, %v1510_v9  ;;  %vm1529_vm0 = vweird.f32 %v1038_v7 }
 0x2b0   :  { %v880_v14 = vpop.f32.mrf.mxu3  ;;  %v1536_v38 = vor.u32 1.1754944e-38, %v1535_v29  ;;  %vm1534_vm3 = vcmp.eq.f32.partialorder %v1533_v33, 8.507059e+37 }
 0x2b1   :  { %v1512_v41 = vmul.f32 %v2042_v5, %v1511_v12  ;;  %v881_v17 = vadd.f32 %v2473_v10, %v880_v14 }
 0x2b3   :  { %v2044_v18 = vpop.eup %2043  ;;  %v1513_v20 = vadd.f32 %v2042_v5, %v1512_v41  ;;  %v1867_v21 = vmul.f32 -1.442695, %v881_v17 }
 0x2b4   :  { %v2046_v22 = vpop.eup %2045  ;;  %v1039_v24 = vadd.f32 1.0, %v2044_v18 }
 0x2b5   :  { %v1517_v25 = vsel %vm1516_vm13, %v2042_v5, %v1513_v20  ;;  %v1525_v26 = vmul.f32 %v2046_v22, %v1038_v7  ;;  %2047 = vpow2.f32 %v1867_v21  ;;  %vm1530_vm15 = vweird.f32 %v2046_v22 }
 0x2b6   :  { %v1522_v27 = vsel %vm1519_vm14, %v1521_v23, %v1517_v25  ;;  %2049 = vrcp.f32 %v1039_v24  ;;  %vm1531_vm2 = vmor %vm1529_vm0, %vm1530_vm15  ;;  %v1550_v45 = vand.u32 2147483648, %v1039_v24  ;;  %v1548_v48 = vand.u32 2147483647, %v1039_v24 }
 0x2b7   :  { %1646 = vst.msk [vmem:[%s2580_s7 + $0xf8] sm:$0xff] %vm1614_vm5, %v1522_v27  ;;  %v1526_v28 = vsub.f32 1.0, %v1525_v26  ;;  %vm1544_vm6 = vweird.f32 %v1039_v24 }
 0x2b8   :  { %v883_v30 = vpop.f32.mrf.mxu3  ;;  %v1551_v54 = vor.u32 1.1754944e-38, %v1550_v45  ;;  %vm1549_vm8 = vcmp.eq.f32.partialorder %v1548_v48, 8.507059e+37 }
 0x2b9   :  { %v1527_v32 = vmul.f32 %v2046_v22, %v1526_v28  ;;  %v884_v34 = vadd.f32 %v2473_v10, %v883_v30 }
 0x2bb   :  { %v2048_v35 = vpop.eup %2047  ;;  %v1528_v36 = vadd.f32 %v2046_v22, %v1527_v32  ;;  %v1868_v37 = vmul.f32 -1.442695, %v884_v34 }
 0x2bc   :  { %v2050_v31 = vpop.eup %2049  ;;  %v1040_v39 = vadd.f32 1.0, %v2048_v35 }
 0x2bd   :  { %v1532_v40 = vsel %vm1531_vm2, %v2046_v22, %v1528_v36  ;;  %v1540_v42 = vmul.f32 %v2050_v31, %v1039_v24  ;;  %2051 = vpow2.f32 %v1868_v37  ;;  %vm1545_vm4 = vweird.f32 %v2050_v31 }
 0x2be   :  { %v1537_v43 = vsel %vm1534_vm3, %v1536_v38, %v1532_v40  ;;  %2053 = vrcp.f32 %v1040_v39  ;;  %vm1546_vm7 = vmor %vm1544_vm6, %vm1545_vm4  ;;  %v1565_v59 = vand.u32 2147483648, %v1040_v39  ;;  %v1563_v62 = vand.u32 2147483647, %v1040_v39 }
 0x2bf   :  { %1647 = vst.msk [vmem:[%s2580_s7 + $0x100] sm:$0xff] %vm1614_vm5, %v1537_v43  ;;  %v1541_v44 = vsub.f32 1.0, %v1540_v42  ;;  %vm1559_vm9 = vweird.f32 %v1040_v39 }
 0x2c0   :  { %v886_v46 = vpop.f32.mrf.mxu3  ;;  %v1566_v19 = vor.u32 1.1754944e-38, %v1565_v59  ;;  %vm1564_vm11 = vcmp.eq.f32.partialorder %v1563_v62, 8.507059e+37 }
 0x2c1   :  { %v1542_v47 = vmul.f32 %v2050_v31, %v1541_v44  ;;  %v887_v49 = vadd.f32 %v2473_v10, %v886_v46 }
 0x2c3   :  { %v2052_v50 = vpop.eup %2051  ;;  %v1543_v51 = vadd.f32 %v2050_v31, %v1542_v47  ;;  %v1869_v52 = vmul.f32 -1.442695, %v887_v49 }
 0x2c4   :  { %v2054_v53 = vpop.eup %2053  ;;  %v1041_v55 = vadd.f32 1.0, %v2052_v50 }
 0x2c5   :  { %v1547_v56 = vsel %vm1546_vm7, %v2050_v31, %v1543_v51  ;;  %v1555_v16 = vmul.f32 %v2054_v53, %v1040_v39  ;;  %2055 = vpow2.f32 %v1869_v52  ;;  %vm1560_vm1 = vweird.f32 %v2054_v53 }
 0x2c6   :  { %v1552_v57 = vsel %vm1549_vm8, %v1551_v54, %v1547_v56  ;;  %2057 = vrcp.f32 %v1041_v55  ;;  %vm1561_vm10 = vmor %vm1559_vm9, %vm1560_vm1  ;;  %v1580_v8 = vand.u32 2147483648, %v1041_v55  ;;  %v1578_v11 = vand.u32 2147483647, %v1041_v55 }
 0x2c7   :  { %1648 = vst.msk [vmem:[%s2580_s7 + $0x108] sm:$0xff] %vm1614_vm5, %v1552_v57  ;;  %v1556_v58 = vsub.f32 1.0, %v1555_v16  ;;  %vm1574_vm13 = vweird.f32 %v1041_v55 }
 0x2c8   :  { %v889_v60 = vpop.f32.mrf.mxu3  ;;  %v1581_v41 = vor.u32 1.1754944e-38, %v1580_v8  ;;  %vm1579_vm15 = vcmp.eq.f32.partialorder %v1578_v11, 8.507059e+37 }
 0x2c9   :  { %v1557_v61 = vmul.f32 %v2054_v53, %v1556_v58  ;;  %v890_v63 = vadd.f32 %v2473_v10, %v889_v60 }
 0x2cb   :  { %v2056_v0 = vpop.eup %2055  ;;  %v1558_v1 = vadd.f32 %v2054_v53, %v1557_v61  ;;  %v1870_v2 = vmul.f32 -1.442695, %v890_v63 }
 0x2cc   :  { %v2058_v3 = vpop.eup %2057  ;;  %v1042_v4 = vadd.f32 1.0, %v2056_v0 }
 0x2cd   :  { %v1562_v5 = vsel %vm1561_vm10, %v2054_v53, %v1558_v1  ;;  %v1570_v6 = vmul.f32 %v2058_v3, %v1041_v55  ;;  %2059 = vpow2.f32 %v1870_v2  ;;  %vm1575_vm12 = vweird.f32 %v2058_v3 }
 0x2ce   :  { %v1567_v7 = vsel %vm1564_vm11, %v1566_v19, %v1562_v5  ;;  %2061 = vrcp.f32 %v1042_v4  ;;  %vm1576_vm14 = vmor %vm1574_vm13, %vm1575_vm12  ;;  %v1595_v22 = vand.u32 2147483648, %v1042_v4  ;;  %v1593_v24 = vand.u32 2147483647, %v1042_v4 }
 0x2cf   :  { %1649 = vst.msk [vmem:[%s2580_s7 + $0x110] sm:$0xff] %vm1614_vm5, %v1567_v7  ;;  %v1571_v10 = vsub.f32 1.0, %v1570_v6  ;;  %vm1589_vm2 = vweird.f32 %v1042_v4 }
 0x2d0   :  { %v1596_v27 = vor.u32 1.1754944e-38, %v1595_v22  ;;  %vm1594_vm4 = vcmp.eq.f32.partialorder %v1593_v24, 8.507059e+37 }
 0x2d1   :  { %v1572_v9 = vmul.f32 %v2058_v3, %v1571_v10 }
 0x2d3   :  { %v2060_v12 = vpop.eup %2059  ;;  %v1573_v13 = vadd.f32 %v2058_v3, %v1572_v9 }
 0x2d4   :  { %v2062_v14 = vpop.eup %2061  ;;  %v1043_v15 = vadd.f32 1.0, %v2060_v12 }
 0x2d5   :  { %v1577_v17 = vsel %vm1576_vm14, %v2058_v3, %v1573_v13  ;;  %v1585_v18 = vmul.f32 %v2062_v14, %v1042_v4  ;;  %vm1590_vm0 = vweird.f32 %v2062_v14 }
 0x2d6   :  { %v1582_v20 = vsel %vm1579_vm15, %v1581_v41, %v1577_v17  ;;  %2063 = vrcp.f32 %v1043_v15  ;;  %vm1591_vm3 = vmor %vm1589_vm2, %vm1590_vm0  ;;  %v1610_v33 = vand.u32 2147483648, %v1043_v15  ;;  %v1608_v35 = vand.u32 2147483647, %v1043_v15 }
 0x2d7   :  { %1650 = vst.msk [vmem:[%s2580_s7 + $0x118] sm:$0xff] %vm1614_vm5, %v1582_v20  ;;  %v1586_v21 = vsub.f32 1.0, %v1585_v18  ;;  %vm1604_vm7 = vweird.f32 %v1043_v15 }
 0x2d8   :  { %v1611_v37 = vor.u32 1.1754944e-38, %v1610_v33  ;;  %vm1609_vm1 = vcmp.eq.f32.partialorder %v1608_v35, 8.507059e+37 }
 0x2d9   :  { %v1587_v23 = vmul.f32 %v2062_v14, %v1586_v21 }
 0x2db   :  { %v1588_v25 = vadd.f32 %v2062_v14, %v1587_v23 }
 0x2dc   :  { %v2064_v26 = vpop.eup %2063 }
 0x2dd   :  { %v1592_v28 = vsel %vm1591_vm3, %v2062_v14, %v1588_v25  ;;  %v1600_v29 = vmul.f32 %v2064_v26, %v1043_v15  ;;  %vm1605_vm6 = vweird.f32 %v2064_v26 }
 0x2de   :  { %v1597_v30 = vsel %vm1594_vm4, %v1596_v27, %v1592_v28  ;;  %vm1606_vm8 = vmor %vm1604_vm7, %vm1605_vm6 }
 0x2df   :  { %1651 = vst.msk [vmem:[%s2580_s7 + $0x120] sm:$0xff] %vm1614_vm5, %v1597_v30  ;;  %v1601_v32 = vsub.f32 1.0, %v1600_v29 }
 0x2e1   :  { %v1602_v34 = vmul.f32 %v2064_v26, %v1601_v32 }
 0x2e3   :  { %v1603_v36 = vadd.f32 %v2064_v26, %v1602_v34 }
 0x2e5   :  { %v1607_v31 = vsel %vm1606_vm8, %v2064_v26, %v1603_v36 }
 0x2e6   :  { %v1612_v38 = vsel %vm1609_vm1, %v1611_v37, %v1607_v31 }
 0x2e7   :  { %1652 = vst.msk [vmem:[%s2580_s7 + $0x128] sm:$0xff] %vm1614_vm5, %v1612_v38 }

</bundles_post_ra>
